<compile_context>
chip_gen: v5e
topology: v5e:2x2
jax: 0.10.0
libtpu: 0.0.40
codegen_flags: <defaults>
</compile_context>

<pallas_src>
import jax
import jax.numpy as jnp
from jax.experimental import pallas as pl
from jax.experimental.pallas import tpu as pltpu

HIDDEN = 64     # hidden_size
FC1 = 32        # fc1 output features
EPS = 1e-5      # BatchNorm eps (PyTorch default)


def _round_up(n, m):
    return ((n + m - 1) // m) * m


def _model_kernel(x_ref, w1_ref, w2_ref, wfc1_ref, consts_ref, out_ref):
    """consts_ref rows: 0 = LSTM-l0 bias [i|o|g], 1 = LSTM-l1 bias [i|o|g],
    2[:32] = fc1 bias (bn1/bn2 folded), 3[:32] = fc2 weight row, 3[32] = fc2 bias."""
    H = HIDDEN
    x = x_ref[...]
    consts = consts_ref[...]

    def lstm_cell(inp, w_t, bias):
        # Gate layout is [i | o | g]; forget gate dropped (multiplies c0 == 0),
        # W_hh term omitted (h0 == 0).
        gates = jnp.dot(inp, w_t, preferred_element_type=jnp.float32) + bias
        sig = jax.nn.sigmoid(gates[:, 0:2 * H])   # [i | o]: 128-lane aligned EUP pass
        g = jnp.tanh(gates[:, 2 * H:3 * H])
        i = sig[:, 0:H]
        o = sig[:, H:2 * H]
        return o * jnp.tanh(i * g)                 # c = i*g  (c0 == 0)

    # 2-layer LSTM (inter-layer dropout is identity in eval mode).
    h1 = lstm_cell(x, w1_ref[...], consts[0:1, :])
    h2 = lstm_cell(h1, w2_ref[...], consts[1:2, :])

    # fc1 with bn1/bn2 pre-folded, then ReLU (dropout1 identity in eval mode).
    y = jnp.dot(h2, wfc1_ref[...], preferred_element_type=jnp.float32)
    y = jnp.maximum(y + consts[2:3, 0:FC1], 0.0)

    # fc2 as (1,32) · (tb,32)^T -> (1, tb): batch lands on lanes, so the
    # store / HBM writeback is lane-dense (4 B per sample, no padded lanes).
    wfc2 = consts[3:4, 0:FC1]                      # (1, 32)
    out_row = jax.lax.dot_general(
        wfc2, y, dimension_numbers=(((1,), (1,)), ((), ())),
        preferred_element_type=jnp.float32)        # (1, tb)
    out_row = out_row + consts[3:4, FC1:FC1 + 1]   # scalar bias, once per sample
    out_ref[0] = out_row                           # out_ref block: (1, 1, tb)


def init_params(key, input_size, hidden=HIDDEN):
    """Deterministic parameter init mirroring the PyTorch module shapes."""
    ks = jax.random.split(key, 10)
    kl = 1.0 / jnp.sqrt(jnp.float32(hidden))

    def u(kk, shape, bound):
        return jax.random.uniform(kk, shape, jnp.float32, -bound, bound)

    params = dict(
        # LSTM layer 0
        w_ih_l0=u(ks[0], (4 * hidden, input_size), kl),
        b_ih_l0=u(ks[1], (4 * hidden,), kl),
        b_hh_l0=u(ks[2], (4 * hidden,), kl),
        # LSTM layer 1
        w_ih_l1=u(ks[3], (4 * hidden, hidden), kl),
        b_ih_l1=u(ks[4], (4 * hidden,), kl),
        b_hh_l1=u(ks[5], (4 * hidden,), kl),
        # bn1 (PyTorch defaults)
        bn1_gamma=jnp.ones((hidden,), jnp.float32),
        bn1_beta=jnp.zeros((hidden,), jnp.float32),
        bn1_mean=jnp.zeros((hidden,), jnp.float32),
        bn1_var=jnp.ones((hidden,), jnp.float32),
        # fc1
        w_fc1=u(ks[6], (FC1, hidden), kl),
        b_fc1=u(ks[7], (FC1,), kl),
        # bn2 (PyTorch defaults)
        bn2_gamma=jnp.ones((FC1,), jnp.float32),
        bn2_beta=jnp.zeros((FC1,), jnp.float32),
        bn2_mean=jnp.zeros((FC1,), jnp.float32),
        bn2_var=jnp.ones((FC1,), jnp.float32),
        # fc2
        w_fc2=u(ks[8], (1, FC1), 1.0 / jnp.sqrt(jnp.float32(FC1))),
        b_fc2=u(ks[9], (1,), 1.0 / jnp.sqrt(jnp.float32(FC1))),
    )
    # NOTE: W_hh_l{0,1} exist in the PyTorch module but multiply the zero
    # initial hidden state for seq_len == 1, so they never affect this forward
    # and are not materialized.
    return params


def _fold_bn(gamma, beta, mean, var):
    scale = gamma / jnp.sqrt(var + EPS)
    shift = beta - mean * scale
    return scale, shift


def _prep_lstm(w_ih, b_ih, b_hh, H):
    """Drop the forget gate and reorder gate columns to [i | o | g]."""
    b = b_ih + b_hh
    w_sel = jnp.concatenate(
        [w_ih[0:H], w_ih[3 * H:4 * H], w_ih[2 * H:3 * H]], axis=0)     # (3H, in)
    b_sel = jnp.concatenate([b[0:H], b[3 * H:4 * H], b[2 * H:3 * H]])  # (3H,)
    return w_sel.T, b_sel                                              # (in, 3H)


def continual_lstm_forward(x, params, tile_b=4096):
    """Eval-mode forward.  x: (B, input_size) f32 -> (B, 1) f32."""
    assert tile_b % 128 == 0, "tile_b must be a multiple of 128 (lane-dense out)"
    H = HIDDEN
    B, in_size = x.shape

    # --- host-side folding / packing ------------------------------------
    w1, b1 = _prep_lstm(params["w_ih_l0"], params["b_ih_l0"],
                        params["b_hh_l0"], H)                    # (in, 3H)
    w2, b2 = _prep_lstm(params["w_ih_l1"], params["b_ih_l1"],
                        params["b_hh_l1"], H)                    # (H, 3H)

    # Fold bn1 and bn2 into fc1.
    s1, t1 = _fold_bn(params["bn1_gamma"], params["bn1_beta"],
                      params["bn1_mean"], params["bn1_var"])
    s2, t2 = _fold_bn(params["bn2_gamma"], params["bn2_beta"],
                      params["bn2_mean"], params["bn2_var"])
    wfc1 = (s1[:, None] * params["w_fc1"].T) * s2[None, :]       # (H, 32)
    bfc1 = (t1 @ params["w_fc1"].T) * s2 + params["b_fc1"] * s2 + t2  # (32,)

    # Pack every bias/shift plus the tiny fc2 weight/bias into ONE array.
    consts = jnp.zeros((4, 3 * H), jnp.float32)
    consts = consts.at[0, :].set(b1)
    consts = consts.at[1, :].set(b2)
    consts = consts.at[2, :FC1].set(bfc1)
    consts = consts.at[3, :FC1].set(params["w_fc2"][0])
    consts = consts.at[3, FC1].set(params["b_fc2"][0])

    # --- batch tiling ----------------------------------------------------
    # Padded rows are computed and discarded (intentional; compute is tiny).
    Bp_min = _round_up(B, 128)
    if Bp_min <= tile_b:
        # Small batch: don't over-pad.  If big enough, split into 2 tiles so
        # both v7x TensorCores get work (v5e/v6e: harmless, single TC).
        tb = _round_up(Bp_min // 2, 1024) if Bp_min >= 2048 else Bp_min
    else:
        tb = tile_b
    Bp = _round_up(B, tb)
    num_tiles = Bp // tb

    xp = x.astype(jnp.float32)
    if Bp != B:
        xp = jnp.pad(xp, ((0, Bp - B), (0, 0)))

    # VMEM (f32, tb=4096, in_size=16): x double-buffer ~4 MiB (16 lanes padded
    # to 128), out double-buffer ~256 KiB, resident weights ~66 KiB — well
    # under every generation's default scoped VMEM.  Lower tile_b if in_size
    # is large.
    in_specs = [
        pl.BlockSpec((tb, in_size), lambda i: (i, 0)),   # x: streamed per tile
        pl.BlockSpec(w1.shape, lambda i: (0, 0)),        # weights: resident
        pl.BlockSpec(w2.shape, lambda i: (0, 0)),
        pl.BlockSpec(wfc1.shape, lambda i: (0, 0)),
        pl.BlockSpec(consts.shape, lambda i: (0, 0)),
    ]
    # Lane-dense output: one (1, 1, tb) block per tile, batch mapped to lanes.
    out_specs = pl.BlockSpec((1, 1, tb), lambda i: (i, 0, 0))

    out = pl.pallas_call(
        _model_kernel,
        out_shape=jax.ShapeDtypeStruct((num_tiles, 1, tb), jnp.float32),
        grid=(num_tiles,),
        in_specs=in_specs,
        out_specs=out_specs,
        compiler_params=pltpu.CompilerParams(
            dimension_semantics=("parallel",)),
    )(xp, w1, w2, wfc1, consts)

    return out.reshape(-1)[:B].reshape(B, 1)


def _reference_forward(x, params):
    """Pure-JAX reference of the eval-mode forward pass (full gate math)."""
    H = HIDDEN

    def cell(inp, w_ih, b):
        gates = inp @ w_ih.T + b
        i = jax.nn.sigmoid(gates[:, 0:H])
        f = jax.nn.sigmoid(gates[:, H:2 * H])
        g = jnp.tanh(gates[:, 2 * H:3 * H])
        o = jax.nn.sigmoid(gates[:, 3 * H:4 * H])
        c = f * 0.0 + i * g   # c0 == 0
        return o * jnp.tanh(c)

    h1 = cell(x, params["w_ih_l0"], params["b_ih_l0"] + params["b_hh_l0"])
    h2 = cell(h1, params["w_ih_l1"], params["b_ih_l1"] + params["b_hh_l1"])
    s1, t1 = _fold_bn(params["bn1_gamma"], params["bn1_beta"],
                      params["bn1_mean"], params["bn1_var"])
    s2, t2 = _fold_bn(params["bn2_gamma"], params["bn2_beta"],
                      params["bn2_mean"], params["bn2_var"])
    y = h2 * s1 + t1
    y = y @ params["w_fc1"].T + params["b_fc1"]
    y = y * s2 + t2
    y = jnp.maximum(y, 0.0)
    y = y @ params["w_fc2"].T + params["b_fc2"]
    return y


if __name__ == "__main__":
    key = jax.random.PRNGKey(0)
    k_x1, k_x2, k_p = jax.random.split(key, 3)

    INPUT_SIZE = 16
    params = init_params(k_p, INPUT_SIZE)

    # Small-batch path (single tile, padding 8 -> 128 rows).
    B1 = 8
    x1 = jax.random.normal(k_x1, (B1, INPUT_SIZE), jnp.float32)
    out1 = jax.block_until_ready(continual_lstm_forward(x1, params))
    ref1 = _reference_forward(x1, params)
    assert out1.shape == (B1, 1)
    assert jnp.allclose(out1, ref1, rtol=1e-4, atol=1e-4), (out1, ref1)

    # Multi-tile path: B not a multiple of the tile -> grid > 1, batch padding,
    # final slice all exercised.
    B2 = 2600
    x2 = jax.random.normal(k_x2, (B2, INPUT_SIZE), jnp.float32)
    out2 = jax.block_until_ready(continual_lstm_forward(x2, params, tile_b=1024))
    ref2 = _reference_forward(x2, params)
    assert out2.shape == (B2, 1)
    assert jnp.allclose(out2, ref2, rtol=1e-4, atol=1e-4)

    print("KERNEL_OK")
</pallas_src>

<mosaic_0001>
module attributes {stable_mosaic.version = 11 : i64} {
  func.func @_model_kernel(%arg0: i32, %arg1: memref<128x16xf32, #tpu.memory_space<vmem>>, %arg2: memref<16x192xf32, #tpu.memory_space<vmem>>, %arg3: memref<64x192xf32, #tpu.memory_space<vmem>>, %arg4: memref<64x32xf32, #tpu.memory_space<vmem>>, %arg5: memref<4x192xf32, #tpu.memory_space<vmem>>, %arg6: memref<1x1x128xf32, #tpu.memory_space<vmem>>) attributes {dimension_semantics = [#tpu.dimension_semantics<parallel>], iteration_bounds = array<i64: 1>, scalar_prefetch = 0 : i64, scratch_operands = 0 : i64, tpu.core_type = #tpu.core_type<tc>, window_params = [{transform_indices = @transform_0, window_bounds = array<i64: 128, 16>}, {pipeline_mode = #tpu.pipeline_mode<synchronous>, transform_indices = @transform_1, window_bounds = array<i64: 16, 192>}, {pipeline_mode = #tpu.pipeline_mode<synchronous>, transform_indices = @transform_2, window_bounds = array<i64: 64, 192>}, {pipeline_mode = #tpu.pipeline_mode<synchronous>, transform_indices = @transform_3, window_bounds = array<i64: 64, 32>}, {pipeline_mode = #tpu.pipeline_mode<synchronous>, transform_indices = @transform_4, window_bounds = array<i64: 4, 192>}, {transform_indices = @transform_5, window_bounds = array<i64: 1, 1, 128>}]} {
    %c0 = arith.constant 0 : index
    %c0_0 = arith.constant 0 : index
    %0 = vector.load %arg1[%c0, %c0_0] : memref<128x16xf32, #tpu.memory_space<vmem>>, vector<128x16xf32>
    %c0_1 = arith.constant 0 : index
    %c0_2 = arith.constant 0 : index
    %1 = vector.load %arg5[%c0_1, %c0_2] : memref<4x192xf32, #tpu.memory_space<vmem>>, vector<4x192xf32>
    %c0_3 = arith.constant 0 : index
    %c0_4 = arith.constant 0 : index
    %2 = vector.load %arg2[%c0_3, %c0_4] : memref<16x192xf32, #tpu.memory_space<vmem>>, vector<16x192xf32>
    %3 = vector.extract_strided_slice %1 {offsets = [0, 0], sizes = [1, 192], strides = [1, 1]} : vector<4x192xf32> to vector<1x192xf32>
    %cst = arith.constant dense<0.000000e+00> : vector<128x192xf32>
    %4 = tpu.matmul %0, %2, %cst {dimension_numbers = #tpu.dot_dimension_numbers<[1], [0], [0], [1], [0, 0, 1, 1], [], []>} : vector<128x16xf32>, vector<16x192xf32>, vector<128x192xf32> -> vector<128x192xf32>
    %5 = vector.broadcast %3 : vector<1x192xf32> to vector<128x192xf32>
    %6 = arith.addf %4, %5 : vector<128x192xf32>
    %7 = vector.extract_strided_slice %6 {offsets = [0, 0], sizes = [128, 128], strides = [1, 1]} : vector<128x192xf32> to vector<128x128xf32>
    %8 = arith.negf %7 : vector<128x128xf32>
    %9 = math.exp %8 : vector<128x128xf32>
    %cst_5 = arith.constant 1.000000e+00 : f32
    %10 = vector.broadcast %cst_5 : f32 to vector<128x128xf32>
    %11 = arith.addf %10, %9 : vector<128x128xf32>
    %12 = arith.divf %10, %11 : vector<128x128xf32>
    %13 = vector.extract_strided_slice %6 {offsets = [0, 128], sizes = [128, 64], strides = [1, 1]} : vector<128x192xf32> to vector<128x64xf32>
    %14 = math.tanh %13 : vector<128x64xf32>
    %15 = vector.extract_strided_slice %12 {offsets = [0, 0], sizes = [128, 64], strides = [1, 1]} : vector<128x128xf32> to vector<128x64xf32>
    %16 = vector.extract_strided_slice %12 {offsets = [0, 64], sizes = [128, 64], strides = [1, 1]} : vector<128x128xf32> to vector<128x64xf32>
    %17 = arith.mulf %15, %14 : vector<128x64xf32>
    %18 = math.tanh %17 : vector<128x64xf32>
    %19 = arith.mulf %16, %18 : vector<128x64xf32>
    %c0_6 = arith.constant 0 : index
    %c0_7 = arith.constant 0 : index
    %20 = vector.load %arg3[%c0_6, %c0_7] : memref<64x192xf32, #tpu.memory_space<vmem>>, vector<64x192xf32>
    %21 = vector.extract_strided_slice %1 {offsets = [1, 0], sizes = [1, 192], strides = [1, 1]} : vector<4x192xf32> to vector<1x192xf32>
    %cst_8 = arith.constant dense<0.000000e+00> : vector<128x192xf32>
    %22 = tpu.matmul %19, %20, %cst_8 {dimension_numbers = #tpu.dot_dimension_numbers<[1], [0], [0], [1], [0, 0, 1, 1], [], []>} : vector<128x64xf32>, vector<64x192xf32>, vector<128x192xf32> -> vector<128x192xf32>
    %23 = vector.broadcast %21 : vector<1x192xf32> to vector<128x192xf32>
    %24 = arith.addf %22, %23 : vector<128x192xf32>
    %25 = vector.extract_strided_slice %24 {offsets = [0, 0], sizes = [128, 128], strides = [1, 1]} : vector<128x192xf32> to vector<128x128xf32>
    %26 = arith.negf %25 : vector<128x128xf32>
    %27 = math.exp %26 : vector<128x128xf32>
    %cst_9 = arith.constant 1.000000e+00 : f32
    %28 = vector.broadcast %cst_9 : f32 to vector<128x128xf32>
    %29 = arith.addf %28, %27 : vector<128x128xf32>
    %30 = arith.divf %28, %29 : vector<128x128xf32>
    %31 = vector.extract_strided_slice %24 {offsets = [0, 128], sizes = [128, 64], strides = [1, 1]} : vector<128x192xf32> to vector<128x64xf32>
    %32 = math.tanh %31 : vector<128x64xf32>
    %33 = vector.extract_strided_slice %30 {offsets = [0, 0], sizes = [128, 64], strides = [1, 1]} : vector<128x128xf32> to vector<128x64xf32>
    %34 = vector.extract_strided_slice %30 {offsets = [0, 64], sizes = [128, 64], strides = [1, 1]} : vector<128x128xf32> to vector<128x64xf32>
    %35 = arith.mulf %33, %32 : vector<128x64xf32>
    %36 = math.tanh %35 : vector<128x64xf32>
    %37 = arith.mulf %34, %36 : vector<128x64xf32>
    %c0_10 = arith.constant 0 : index
    %c0_11 = arith.constant 0 : index
    %38 = vector.load %arg4[%c0_10, %c0_11] : memref<64x32xf32, #tpu.memory_space<vmem>>, vector<64x32xf32>
    %cst_12 = arith.constant dense<0.000000e+00> : vector<128x32xf32>
    %39 = tpu.matmul %37, %38, %cst_12 {dimension_numbers = #tpu.dot_dimension_numbers<[1], [0], [0], [1], [0, 0, 1, 1], [], []>} : vector<128x64xf32>, vector<64x32xf32>, vector<128x32xf32> -> vector<128x32xf32>
    %40 = vector.extract_strided_slice %1 {offsets = [2, 0], sizes = [1, 32], strides = [1, 1]} : vector<4x192xf32> to vector<1x32xf32>
    %41 = vector.broadcast %40 : vector<1x32xf32> to vector<128x32xf32>
    %42 = arith.addf %39, %41 : vector<128x32xf32>
    %cst_13 = arith.constant 0.000000e+00 : f32
    %43 = vector.broadcast %cst_13 : f32 to vector<128x32xf32>
    %44 = arith.maximumf %42, %43 : vector<128x32xf32>
    %45 = vector.extract_strided_slice %1 {offsets = [3, 0], sizes = [1, 32], strides = [1, 1]} : vector<4x192xf32> to vector<1x32xf32>
    %cst_14 = arith.constant dense<0.000000e+00> : vector<1x128xf32>
    %46 = tpu.matmul %45, %44, %cst_14 {dimension_numbers = #tpu.dot_dimension_numbers<[1], [1], [0], [0], [0, 0, 1, 0], [], []>} : vector<1x32xf32>, vector<128x32xf32>, vector<1x128xf32> -> vector<1x128xf32>
    %47 = vector.extract_strided_slice %1 {offsets = [3, 32], sizes = [1, 1], strides = [1, 1]} : vector<4x192xf32> to vector<1x1xf32>
    %48 = vector.broadcast %47 : vector<1x1xf32> to vector<1x128xf32>
    %49 = arith.addf %46, %48 : vector<1x128xf32>
    %c0_15 = arith.constant 0 : index
    %c0_16 = arith.constant 0 : index
    %c0_17 = arith.constant 0 : index
    %50 = vector.load %arg6[%c0_15, %c0_16, %c0_17] : memref<1x1x128xf32, #tpu.memory_space<vmem>>, vector<1x1x128xf32>
    %51 = vector.shape_cast %50 : vector<1x1x128xf32> to vector<1x128xf32>
    %52 = vector.shape_cast %49 : vector<1x128xf32> to vector<1x1x128xf32>
    tpu.vector_store %arg6[%c0_15, %c0_16, %c0_17], %52 {strides = array<i32>} : memref<1x1x128xf32, #tpu.memory_space<vmem>>, vector<1x1x128xf32>,
    return
  }
  func.func @transform_0(%arg0: i32) -> (i32, i32) {
    %c0_i32 = arith.constant 0 : i32
    %c0_i32_0 = arith.constant 0 : i32
    return %arg0, %c0_i32 : i32, i32
  }
  func.func @transform_1(%arg0: i32) -> (i32, i32) {
    %c0_i32 = arith.constant 0 : i32
    %c0_i32_0 = arith.constant 0 : i32
    %c0_i32_1 = arith.constant 0 : i32
    return %c0_i32, %c0_i32_0 : i32, i32
  }
  func.func @transform_2(%arg0: i32) -> (i32, i32) {
    %c0_i32 = arith.constant 0 : i32
    %c0_i32_0 = arith.constant 0 : i32
    %c0_i32_1 = arith.constant 0 : i32
    return %c0_i32, %c0_i32_0 : i32, i32
  }
  func.func @transform_3(%arg0: i32) -> (i32, i32) {
    %c0_i32 = arith.constant 0 : i32
    %c0_i32_0 = arith.constant 0 : i32
    %c0_i32_1 = arith.constant 0 : i32
    return %c0_i32, %c0_i32_0 : i32, i32
  }
  func.func @transform_4(%arg0: i32) -> (i32, i32) {
    %c0_i32 = arith.constant 0 : i32
    %c0_i32_0 = arith.constant 0 : i32
    %c0_i32_1 = arith.constant 0 : i32
    return %c0_i32, %c0_i32_0 : i32, i32
  }
  func.func @transform_5(%arg0: i32) -> (i32, i32, i32) {
    %c0_i32 = arith.constant 0 : i32
    %c0_i32_0 = arith.constant 0 : i32
    %c0_i32_1 = arith.constant 0 : i32
    return %arg0, %c0_i32, %c0_i32_0 : i32, i32, i32
  }
}

</mosaic_0001>

<bundles_post_ra>
// kernel: tpu_custom_call.1
= control target key start
LH: loop header
LB: loop body
LE: loop exit
PB: predicated region body
PF: predicated region fallthrough
CT: control target
= control target key end

     0   :  { %vm49_vm0 = vcmask 130048   ;;  %s2791_s0 = inlined_call_operand.vmem [shape: f32[128,16], index: 0, kind: input, shape index: {}]   ;;  %s2792_s1 = inlined_call_operand.vmem [shape: f32[16,192], index: 1, kind: input, shape index: {}]   ;;  %s2793_s2 = inlined_call_operand.vmem [shape: f32[64,192], index: 2, kind: input, shape index: {}]   ;;  %s2794_s3 = inlined_call_operand.vmem [shape: f32[64,32], index: 3, kind: input, shape index: {}]   ;;  %s2795_s4 = inlined_call_operand.vmem [shape: f32[4,192], index: 4, kind: input, shape index: {}]   ;;  %s2796_s5 = inlined_call_operand.hbm [shape: f32[1,1,128], index: 5, kind: output, shape index: {}]  }
   0x1   :  { %v40_v0 = vld [vmem:[%s2792_s1 + $0x10] sm:$0xff]  ;;  %v38_v1 = vld [vmem:[%s2792_s1] sm:$0xff]  ;;  %v26_v3 = vld [vmem:[%s2791_s0 + $0x28] sm:$0xff] }
   0x2   :  { %112 = vmatpush.msra.mxu0 %v40_v0  ;;  %1724 = vmatpush.msra.mxu1 %v40_v0  ;;  %v21_v2 = vld [vmem:[%s2791_s0] sm:$0xff]  ;;  %v41_v4 = vld [vmem:[%s2792_s1 + $0x18] sm:$0xff] }
   0x3   :  { %1725 = vmatpush.msra.mxu2 %v40_v0  ;;  %1726 = vmatpush.msra.mxu3 %v40_v0 }
   0x4   :  { %113 = vmatpush.msra.mxu0 %v38_v1  ;;  %1727 = vmatpush.msra.mxu1 %v38_v1 }
   0x5   :  { %10 = vsyncpa [#allocation3], 0  ;;  %1595 = vmatmul.msk.f32.vlgmr.msra.gmra.mxu0 %vm49_vm0, %v21_v2  ;;  %1600 = vmatmul.msk.f32.vlgmr.msra.gmra.mxu1 %vm49_vm0, %v26_v3  ;;  %v39_v5 = vld [vmem:[%s2792_s1 + $0x8] sm:$0xff]  ;;  %v27_v6 = vld [vmem:[%s2791_s0 + $0x30] sm:$0xff]  ;;  %s2020_s30 = smov 64  }
   0x6   :  { %177 = vmatpush.msrb.mxu1 %v41_v4  ;;  %1728 = vmatpush.msra.mxu2 %v38_v1  ;;  %v22_v7 = vld [vmem:[%s2791_s0 + $0x8] sm:$0xff]  ;;  %v28_v8 = vld [vmem:[%s2791_s0 + $0x38] sm:$0xff]  ;;  %v23_v9 = vld [vmem:[%s2791_s0 + $0x10] sm:$0xff] }
   0x7   :  { %1729 = vmatpush.msra.mxu3 %v38_v1  ;;  %v29_v10 = vld [vmem:[%s2791_s0 + $0x40] sm:$0xff]  ;;  %v24_v11 = vld [vmem:[%s2791_s0 + $0x18] sm:$0xff]  ;;  %v30_v13 = vld [vmem:[%s2791_s0 + $0x48] sm:$0xff] }
   0x8   :  { %178 = vmatpush.msrb.mxu1 %v39_v5  ;;  %v25_v12 = vld [vmem:[%s2791_s0 + $0x20] sm:$0xff]  ;;  %1604 = vmatmul.msk.f32.vlgmr.msra.gmra.mxu2 %vm49_vm0, %v30_v13  ;;  %v31_v17 = vld [vmem:[%s2791_s0 + $0x50] sm:$0xff]  ;;  %v32_v18 = vld [vmem:[%s2791_s0 + $0x58] sm:$0xff] }
   0x9   :  { %v37_v14 = vld [vmem:[%s2795_s4] sm:$0xff]  ;;  %1606 = vmatmul.msk.f32.vlgmr.msra.gmra.mxu3 %vm49_vm0, %v32_v18  ;;  %v34_v35 = vld [vmem:[%s2791_s0 + $0x68] sm:$0xff] }
   0xa   :  { %v43_v15 = vperm.slane %v37_v14, 0  ;;  %v33_v23 = vld [vmem:[%s2791_s0 + $0x60] sm:$0xff]  ;;  %v44_v41 = vperm.slane %v37_v14, 4 }
   0xc   :  { %v2119_v16 = vperm.slane %v43_v15, 0  ;;  %v2154_v47 = vperm.slane %v44_v41, 0 }
   0xd   :  { %1601 = vmatmul.msk.f32.gmra.mxu1 %vm49_vm0, %v27_v6  ;;  %1596 = vmatmul.msk.f32.gmra.mxu0 %vm49_vm0, %v22_v7 }
  0x10   :  { %1605 = vmatmul.msk.f32.gmra.mxu2 %vm49_vm0, %v31_v17 }
  0x11   :  { %1607 = vmatmul.msk.f32.gmra.mxu3 %vm49_vm0, %v33_v23 }
  0x15   :  { %1602 = vmatmul.msk.f32.gmra.mxu1 %vm49_vm0, %v28_v8  ;;  %1597 = vmatmul.msk.f32.gmra.mxu0 %vm49_vm0, %v23_v9 }
  0x19   :  { %1608 = vmatmul.msk.f32.gmra.mxu3 %vm49_vm0, %v34_v35 }
  0x1d   :  { %1603 = vmatmul.msk.f32.gmra.mxu1 %vm49_vm0, %v29_v10  ;;  %1598 = vmatmul.msk.f32.gmra.mxu0 %vm49_vm0, %v24_v11 }
  0x25   :  { %1611 = vmatmul.msk.f32.vlgmr.msrb.gmra.mxu1 %vm49_vm0, %v21_v2  ;;  %1599 = vmatmul.msk.f32.gmra.mxu0 %vm49_vm0, %v25_v12 }
  0x2d   :  { %1612 = vmatmul.msk.f32.gmra.mxu1 %vm49_vm0, %v22_v7 }
  0x35   :  { %1613 = vmatmul.msk.f32.gmra.mxu1 %vm49_vm0, %v23_v9 }
  0x3d   :  { %1614 = vmatmul.msk.f32.gmra.mxu1 %vm49_vm0, %v24_v11 }
  0x45   :  { %1615 = vmatmul.msk.f32.gmra.mxu1 %vm49_vm0, %v25_v12 }
  0x4d   :  { %1616 = vmatmul.msk.f32.gmra.mxu1 %vm49_vm0, %v26_v3 }
  0x55   :  { %1617 = vmatmul.msk.f32.gmra.mxu1 %vm49_vm0, %v27_v6 }
  0x5d   :  { %1618 = vmatmul.msk.f32.gmra.mxu1 %vm49_vm0, %v28_v8 }
  0x65   :  { %1619 = vmatmul.msk.f32.gmra.mxu1 %vm49_vm0, %v29_v10 }
  0x6d   :  { %1620 = vmatmul.msk.f32.gmra.mxu1 %vm49_vm0, %v30_v13 }
  0x75   :  { %1621 = vmatmul.msk.f32.gmra.mxu1 %vm49_vm0, %v31_v17 }
  0x7d   :  { %1622 = vmatmul.msk.f32.gmra.mxu1 %vm49_vm0, %v32_v18 }
  0x82   :  { %v115_v19 = vpop.f32.mrf.mxu0  ;;  %v130_v20 = vpop.f32.mrf.mxu1 }
  0x83   :  { %v116_v21 = vadd.f32 %v115_v19, %v2119_v16  ;;  %v131_v45 = vadd.f32 %v130_v20, %v2119_v16 }
  0x85   :  { %v1627_v22 = vmul.f32 -1.442695, %v116_v21  ;;  %1623 = vmatmul.msk.f32.gmra.mxu1 %vm49_vm0, %v33_v23  ;;  %v1632_v51 = vmul.f32 -1.442695, %v131_v45 }
  0x87   :  { %1736 = vpow2.f32 %v1627_v22 }
  0x8a   :  { %v133_v24 = vpop.f32.mrf.mxu1  ;;  %v118_v25 = vpop.f32.mrf.mxu0 }
  0x8b   :  { %v119_v26 = vadd.f32 %v118_v25, %v2119_v16  ;;  %v134_v5 = vadd.f32 %v133_v24, %v2119_v16 }
  0x8d   :  { %v1737_v27 = vpop.eup %1736  ;;  %v1628_v29 = vmul.f32 -1.442695, %v119_v26  ;;  %1624 = vmatmul.msk.f32.gmra.mxu1 %vm49_vm0, %v34_v35  ;;  %v1633_v20 = vmul.f32 -1.442695, %v134_v5 }
  0x8e   :  { %v2137_v28 = vadd.f32 1.0, %v1737_v27 }
  0x90   :  { %1738 = vrcp.f32 %v2137_v28  ;;  %v303_v57 = vand.u32 2147483648, %v2137_v28  ;;  %vm297_vm1 = vweird.f32 %v2137_v28  ;;  %v301_v62 = vand.u32 2147483647, %v2137_v28 }
  0x91   :  { %1740 = vpow2.f32 %v1628_v29 }
  0x92   :  { %v2141_v30 = vpop.f32.mrf.mxu1  ;;  %v121_v31 = vpop.f32.mrf.mxu0  ;;  %v304_v1 = vor.u32 1.1754944e-38, %v303_v57  ;;  %vm302_vm6 = vcmp.eq.f32.partialorder %v301_v62, 8.507059e+37 }
  0x93   :  { %v122_v32 = vadd.f32 %v121_v31, %v2119_v16  ;;  %v142_v57 = vpop.f32.mrf.mxu2 }
  0x95   :  { %v1629_v33 = vmul.f32 -1.442695, %v122_v32 }
  0x96   :  { %v1739_v34 = vpop.eup %1738 }
  0x97   :  { %v1741_v36 = vpop.eup %1740  ;;  %v293_v37 = vmul.f32 %v1739_v34, %v2137_v28  ;;  %1742 = vpow2.f32 %v1629_v33  ;;  %vm298_vm2 = vweird.f32 %v1739_v34 }
  0x98   :  { %v277_v38 = vadd.f32 1.0, %v1741_v36  ;;  %vm2164_vm3 = vmor %vm297_vm1, %vm298_vm2 }
  0x99   :  { %v294_v43 = vsub.f32 1.0, %v293_v37 }
  0x9a   :  { %v2150_v39 = vpop.f32.mrf.mxu1  ;;  %v124_v40 = vpop.f32.mrf.mxu0  ;;  %1744 = vrcp.f32 %v277_v38  ;;  %vm312_vm4 = vweird.f32 %v277_v38  ;;  %v316_v7 = vand.u32 2147483647, %v277_v38  ;;  %v318_v8 = vand.u32 2147483648, %v277_v38 }
  0x9b   :  { %v125_v42 = vadd.f32 %v124_v40, %v2119_v16  ;;  %v295_v49 = vmul.f32 %v1739_v34, %v294_v43 }
  0x9c   :  { %vm317_vm8 = vcmp.eq.f32.partialorder %v316_v7, 8.507059e+37  ;;  %v319_v21 = vor.u32 1.1754944e-38, %v318_v8 }
  0x9d   :  { %v1630_v44 = vmul.f32 -1.442695, %v125_v42  ;;  %v1743_v46 = vpop.eup %1742  ;;  %v296_v59 = vadd.f32 %v1739_v34, %v295_v49 }
  0x9e   :  { %v2156_v48 = vadd.f32 1.0, %v1743_v46 }
  0x9f   :  { %1746 = vpow2.f32 %v1630_v44  ;;  %v300_v4 = vsel %vm2164_vm3, %v1739_v34, %v296_v59 }
  0xa0   :  { %v1745_v50 = vpop.eup %1744  ;;  %1748 = vrcp.f32 %v2156_v48  ;;  %v2183_v15 = vsel %vm302_vm6, %v304_v1, %v300_v4  ;;  %vm327_vm9 = vweird.f32 %v2156_v48  ;;  %v333_v28 = vand.u32 2147483648, %v2156_v48 }
  0xa1   :  { %v308_v52 = vmul.f32 %v1745_v50, %v277_v38  ;;  %vm313_vm5 = vweird.f32 %v1745_v50  ;;  %v331_v32 = vand.u32 2147483647, %v2156_v48 }
  0xa2   :  { %v180_v53 = vpop.f32.mrf.mxu1  ;;  %v127_v54 = vpop.f32.mrf.mxu0  ;;  %vm2179_vm7 = vmor %vm312_vm4, %vm313_vm5  ;;  %v334_v41 = vor.u32 1.1754944e-38, %v333_v28 }
  0xa3   :  { %v181_v55 = vadd.f32 %v180_v53, %v2154_v47  ;;  %v128_v56 = vadd.f32 %v127_v54, %v2119_v16  ;;  %v309_v58 = vsub.f32 1.0, %v308_v52  ;;  %vm332_vm12 = vcmp.eq.f32.partialorder %v331_v32, 8.507059e+37 }
  0xa5   :  { %1750 = vtanh.f32 %v181_v55  ;;  %v1631_v60 = vmul.f32 -1.442695, %v128_v56  ;;  %v310_v61 = vmul.f32 %v1745_v50, %v309_v58  ;;  %v1747_v63 = vpop.eup %1746 }
  0xa6   :  { %1752 = vpow2.f32 %v1632_v51  ;;  %v2168_v2 = vpop.eup %1748  ;;  %v2170_v3 = vadd.f32 1.0, %v1747_v63 }
  0xa7   :  { %1754 = vpow2.f32 %v1631_v60  ;;  %v323_v6 = vmul.f32 %v2168_v2, %v2156_v48  ;;  %v311_v10 = vadd.f32 %v1745_v50, %v310_v61  ;;  %vm328_vm10 = vweird.f32 %v2168_v2 }
  0xa8   :  { %1756 = vrcp.f32 %v2170_v3  ;;  %vm2203_vm11 = vmor %vm327_vm9, %vm328_vm10  ;;  %vm342_vm13 = vweird.f32 %v2170_v3  ;;  %v348_v48 = vand.u32 2147483648, %v2170_v3  ;;  %v346_v53 = vand.u32 2147483647, %v2170_v3 }
  0xa9   :  { %v324_v12 = vsub.f32 1.0, %v323_v6  ;;  %v315_v22 = vsel %vm2179_vm7, %v1745_v50, %v311_v10 }
  0xaa   :  { %v183_v9 = vpop.f32.mrf.mxu1  ;;  %v2195_v27 = vsel %vm317_vm8, %v319_v21, %v315_v22  ;;  %v349_v61 = vor.u32 1.1754944e-38, %v348_v48  ;;  %vm347_vm1 = vcmp.eq.f32.partialorder %v346_v53, 8.507059e+37 }
  0xab   :  { %v1751_v11 = vpop.eup %1750  ;;  %v184_v13 = vadd.f32 %v183_v9, %v2154_v47  ;;  %v325_v24 = vmul.f32 %v2168_v2, %v324_v12 }
  0xac   :  { %v1753_v17 = vpop.eup %1752  ;;  %v548_v18 = vmul.f32 %v1751_v11, %v2183_v15 }
  0xad   :  { %v1755_v19 = vpop.eup %1754  ;;  %1758 = vtanh.f32 %v184_v13  ;;  %v326_v31 = vadd.f32 %v2168_v2, %v325_v24  ;;  %v2200_v34 = vadd.f32 1.0, %v1753_v17 }
  0xae   :  { %v2188_v23 = vadd.f32 1.0, %v1755_v19  ;;  %1760 = vtanh.f32 %v548_v18  ;;  %v1757_v25 = vpop.eup %1756 }
  0xaf   :  { %v338_v26 = vmul.f32 %v1757_v25, %v2170_v3  ;;  %v330_v44 = vsel %vm2203_vm11, %v2168_v2, %v326_v31  ;;  %vm343_vm14 = vweird.f32 %v1757_v25  ;;  %vm372_vm7 = vweird.f32 %v2200_v34 }
  0xb0   :  { %1762 = vrcp.f32 %v2188_v23  ;;  %v2216_v49 = vsel %vm332_vm12, %v334_v41, %v330_v44  ;;  %vm2222_vm15 = vmor %vm342_vm13, %vm343_vm14  ;;  %vm357_vm2 = vweird.f32 %v2188_v23  ;;  %v363_v2 = vand.u32 2147483648, %v2188_v23 }
  0xb1   :  { %1764 = vpow2.f32 %v1633_v20  ;;  %v339_v35 = vsub.f32 1.0, %v338_v26  ;;  %v361_v5 = vand.u32 2147483647, %v2188_v23  ;;  %v378_v26 = vand.u32 2147483648, %v2200_v34 }
  0xb2   :  { %v186_v29 = vpop.f32.mrf.mxu1  ;;  %v364_v12 = vor.u32 1.1754944e-38, %v363_v2  ;;  %v376_v28 = vand.u32 2147483647, %v2200_v34  ;;  %v145_v2 = vpop.f32.mrf.mxu2 }
  0xb3   :  { %v1759_v33 = vpop.eup %1758  ;;  %v187_v36 = vadd.f32 %v186_v29, %v2154_v47  ;;  %v340_v43 = vmul.f32 %v1757_v25, %v339_v35  ;;  %vm362_vm5 = vcmp.eq.f32.partialorder %v361_v5, 8.507059e+37  ;;  %v35_v29 = vld [vmem:[%s2791_s0 + $0x70] sm:$0xff] }
  0xb4   :  { %v1761_v38 = vpop.eup %1760  ;;  %v549_v40 = vmul.f32 %v1759_v33, %v2195_v27  ;;  %1609 = vmatmul.msk.f32.gmra.mxu3 %vm49_vm0, %v35_v29  ;;  %1625 = vmatmul.msk.f32.gmra.mxu1 %vm49_vm0, %v35_v29  ;;  %v379_v33 = vor.u32 1.1754944e-38, %v378_v26  ;;  %vm377_vm9 = vcmp.eq.f32.partialorder %v376_v28, 8.507059e+37 }
  0xb5   :  { %1766 = vtanh.f32 %v187_v36  ;;  %596 = vrot.lane.b32.xlu0 %v1761_v38, %s2020_s30  ;;  %v341_v52 = vadd.f32 %v1757_v25, %v340_v43 }
  0xb6   :  { %v1763_v42 = vpop.eup %1762  ;;  %1768 = vtanh.f32 %v549_v40 }
  0xb7   :  { %1770 = vrcp.f32 %v2200_v34  ;;  %v353_v45 = vmul.f32 %v1763_v42, %v2188_v23  ;;  %v1765_v46 = vpop.eup %1764  ;;  %v345_v62 = vsel %vm2222_vm15, %v1757_v25, %v341_v52  ;;  %vm358_vm3 = vweird.f32 %v1763_v42 }
  0xb8   :  { %v2219_v55 = vadd.f32 1.0, %v1765_v46  ;;  %v2233_v1 = vsel %vm347_vm1, %v349_v61, %v345_v62  ;;  %vm359_vm4 = vmor %vm357_vm2, %vm358_vm3  ;;  %v148_v62 = vpop.f32.mrf.mxu3 }
  0xb9   :  { %v354_v50 = vsub.f32 1.0, %v353_v45 }
  0xba   :  { %v189_v51 = vpop.f32.mrf.mxu1  ;;  %v393_v43 = vand.u32 2147483648, %v2219_v55  ;;  %vm387_vm11 = vweird.f32 %v2219_v55  ;;  %v391_v44 = vand.u32 2147483647, %v2219_v55 }
  0xbb   :  { %v1767_v54 = vpop.eup %1766  ;;  %v190_v56 = vadd.f32 %v189_v51, %v2154_v47  ;;  %v355_v63 = vmul.f32 %v1763_v42, %v354_v50 }
  0xbc   :  { %v1769_v58 = vpop.eup %1768  ;;  %v550_v59 = vmul.f32 %v1767_v54, %v2216_v49  ;;  %v394_v46 = vor.u32 1.1754944e-38, %v393_v43  ;;  %vm392_vm13 = vcmp.eq.f32.partialorder %v391_v44, 8.507059e+37  ;;  %v137_v54 = vadd.f32 %v2141_v30, %v2119_v16 }
  0xbd   :  { %v1771_v60 = vpop.eup %1770  ;;  %1772 = vtanh.f32 %v190_v56  ;;  %598 = vrot.lane.b32.xlu0 %v1769_v58, %s2020_s30  ;;  %v356_v4 = vadd.f32 %v1763_v42, %v355_v63  ;;  %v140_v56 = vadd.f32 %v2150_v39, %v2119_v16  ;;  %v146_v30 = vadd.f32 %v145_v2, %v2119_v16 }
  0xbe   :  { %1774 = vtanh.f32 %v550_v59  ;;  %v368_v0 = vmul.f32 %v1771_v60, %v2200_v34  ;;  %vm373_vm6 = vweird.f32 %v1771_v60 }
  0xbf   :  { %1776 = vrcp.f32 %v2219_v55  ;;  %v360_v13 = vsel %vm359_vm4, %v1763_v42, %v356_v4  ;;  %vm374_vm8 = vmor %vm372_vm7, %vm373_vm6  ;;  %v36_v42 = vld [vmem:[%s2791_s0 + $0x78] sm:$0xff]  ;;  %v1635_v58 = vmul.f32 -1.442695, %v140_v56  ;;  %v149_v4 = vadd.f32 %v148_v62, %v2119_v16  ;;  %s1586_s0 = sshll.u32 %s2796_s5, 4  ;;  %s1587_s0 = int_to_ptr.hbm [resolvable:$true] %s1586_s0 }
  0xc0   :  { %v369_v9 = vsub.f32 1.0, %v368_v0  ;;  %v2241_v18 = vsel %vm362_vm5, %v364_v12, %v360_v13  ;;  %1610 = vmatmul.msk.f32.gmra.mxu3 %vm49_vm0, %v36_v42  ;;  %1626 = vmatmul.msk.f32.gmra.mxu1 %vm49_vm0, %v36_v42  ;;  %v1637_v5 = vmul.f32 -1.442695, %v146_v30 }
  0xc2   :  { %v192_v3 = vpop.f32.mrf.mxu1  ;;  %v370_v17 = vmul.f32 %v1771_v60, %v369_v9 }
  0xc3   :  { %v1773_v6 = vpop.eup %1772  ;;  %v193_v7 = vadd.f32 %v192_v3, %v2154_v47 }
  0xc4   :  { %v1775_v8 = vpop.eup %1774  ;;  %v551_v10 = vmul.f32 %v1773_v6, %v2233_v1  ;;  %v371_v24 = vadd.f32 %v1771_v60, %v370_v17 }
  0xc5   :  { %v1777_v11 = vpop.eup %1776  ;;  %1778 = vtanh.f32 %v193_v7  ;;  %600 = vrot.lane.b32.xlu1 %v1775_v8, %s2020_s30  ;;  %v1638_v7 = vmul.f32 -1.442695, %v149_v4  ;;  %v151_v8 = vpop.f32.mrf.mxu3 }
  0xc6   :  { %1780 = vtanh.f32 %v551_v10  ;;  %v383_v14 = vmul.f32 %v1777_v11, %v2219_v55  ;;  %v375_v31 = vsel %vm374_vm8, %v1771_v60, %v371_v24  ;;  %vm388_vm10 = vweird.f32 %v1777_v11 }
  0xc7   :  { %v2254_v37 = vsel %vm377_vm9, %v379_v33, %v375_v31  ;;  %vm389_vm12 = vmor %vm387_vm11, %vm388_vm10  ;;  %v1634_v55 = vmul.f32 -1.442695, %v137_v54  ;;  %v143_v60 = vadd.f32 %v142_v57, %v2119_v16 }
  0xc8   :  { %v384_v23 = vsub.f32 1.0, %v383_v14 }
  0xc9   :  { %v1636_v0 = vmul.f32 -1.442695, %v143_v60 }
  0xca   :  { %v195_v19 = vpop.f32.mrf.mxu1  ;;  %v385_v32 = vmul.f32 %v1777_v11, %v384_v23 }
  0xcb   :  { %v1779_v20 = vpop.eup %1778  ;;  %v196_v21 = vadd.f32 %v195_v19, %v2154_v47 }
  0xcc   :  { %v1781_v22 = vpop.eup %1780  ;;  %v552_v25 = vmul.f32 %v1779_v20, %v2241_v18  ;;  %v386_v41 = vadd.f32 %v1777_v11, %v385_v32 }
  0xcd   :  { %1782 = vtanh.f32 %v196_v21  ;;  %602 = vrot.lane.b32.xlu1 %v1781_v22, %s2020_s30  ;;  %v154_v33 = vpop.f32.mrf.mxu3 }
  0xce   :  { %1784 = vtanh.f32 %v552_v25  ;;  %v390_v45 = vsel %vm389_vm12, %v1777_v11, %v386_v41  ;;  %v152_v11 = vadd.f32 %v151_v8, %v2119_v16  ;;  %v155_v43 = vadd.f32 %v154_v33, %v2119_v16 }
  0xcf   :  { %v2267_v50 = vsel %vm392_vm13, %v394_v46, %v390_v45 }
  0xd0   :  { %v1639_v17 = vmul.f32 -1.442695, %v152_v11 }
  0xd2   :  { %v198_v35 = vpop.f32.mrf.mxu1 }
  0xd3   :  { %v1783_v36 = vpop.eup %1782  ;;  %v199_v34 = vadd.f32 %v198_v35, %v2154_v47 }
  0xd4   :  { %v1785_v38 = vpop.eup %1784  ;;  %v553_v40 = vmul.f32 %v1783_v36, %v2254_v37 }
  0xd5   :  { %1786 = vtanh.f32 %v199_v34  ;;  %604 = vrot.lane.b32.xlu2 %v1785_v38, %s2020_s30 }
  0xd6   :  { %1788 = vtanh.f32 %v553_v40 }
  0xda   :  { %v201_v63 = vpop.f32.mrf.mxu1 }
  0xdb   :  { %v1787_v48 = vpop.eup %1786  ;;  %v202_v24 = vadd.f32 %v201_v63, %v2154_v47 }
  0xdc   :  { %v1789_v51 = vpop.eup %1788  ;;  %v554_v52 = vmul.f32 %v1787_v48, %v2267_v50 }
  0xdd   :  { %606 = vrot.lane.b32.xlu2 %v1789_v51, %s2020_s30 }
  0xde   :  { %1790 = vtanh.f32 %v554_v52 }
  0xdf   :  { %1792 = vpow2.f32 %v1634_v55 }
  0xe0   :  { %1794 = vpow2.f32 %v1635_v58  ;;  %v1640_v58 = vmul.f32 -1.442695, %v155_v43 }
  0xe2   :  { %v204_v10 = vpop.f32.mrf.mxu1 }
  0xe3   :  { %v205_v36 = vadd.f32 %v204_v10, %v2154_v47 }
  0xe4   :  { %v1791_v53 = vpop.eup %1790 }
  0xe5   :  { %608 = vrot.lane.b32.xlu1 %v1791_v53, %s2020_s30  ;;  %v1793_v59 = vpop.eup %1792 }
  0xe6   :  { %v2277_v61 = vadd.f32 1.0, %v1793_v59  ;;  %v1795_v3 = vpop.eup %1794 }
  0xe7   :  { %v2281_v39 = vadd.f32 1.0, %v1795_v3 }
  0xe8   :  { %1796 = vrcp.f32 %v2277_v61  ;;  %v408_v40 = vand.u32 2147483648, %v2277_v61  ;;  %vm402_vm14 = vweird.f32 %v2277_v61  ;;  %v406_v41 = vand.u32 2147483647, %v2277_v61 }
  0xe9   :  { %1798 = vpow2.f32 %v1636_v0  ;;  %v423_v55 = vand.u32 2147483648, %v2281_v39  ;;  %vm417_vm3 = vweird.f32 %v2281_v39  ;;  %v421_v57 = vand.u32 2147483647, %v2281_v39 }
  0xea   :  { %1800 = vrcp.f32 %v2281_v39  ;;  %v207_v22 = vpop.f32.mrf.mxu1  ;;  %v409_v54 = vor.u32 1.1754944e-38, %v408_v40  ;;  %vm407_vm2 = vcmp.eq.f32.partialorder %v406_v41, 8.507059e+37 }
  0xeb   :  { %1802 = vpow2.f32 %v1637_v5  ;;  %v424_v3 = vor.u32 1.1754944e-38, %v423_v55  ;;  %vm422_vm5 = vcmp.eq.f32.partialorder %v421_v57, 8.507059e+37 }
  0xec   :  { %1804 = vpow2.f32 %v1638_v7 }
  0xee   :  { %v1797_v6 = vpop.eup %1796 }
  0xef   :  { %v1799_v9 = vpop.eup %1798  ;;  %v398_v12 = vmul.f32 %v1797_v6, %v2277_v61  ;;  %vm403_vm0 = vweird.f32 %v1797_v6 }
  0xf0   :  { %v2287_v13 = vadd.f32 1.0, %v1799_v9  ;;  %v2289_v14 = vpop.eup %1800  ;;  %vm2311_vm15 = vmor %vm402_vm14, %vm403_vm0 }
  0xf1   :  { %v399_v19 = vsub.f32 1.0, %v398_v12  ;;  %v1803_v20 = vpop.eup %1802  ;;  %v413_v21 = vmul.f32 %v2289_v14, %v2281_v39  ;;  %vm418_vm1 = vweird.f32 %v2289_v14  ;;  %v208_v39 = vadd.f32 %v207_v22, %v2154_v47 }
  0xf2   :  { %1806 = vrcp.f32 %v2287_v13  ;;  %v1805_v23 = vpop.eup %1804  ;;  %v2295_v26 = vadd.f32 1.0, %v1803_v20  ;;  %v210_v42 = vpop.f32.mrf.mxu1  ;;  %vm2332_vm4 = vmor %vm417_vm3, %vm418_vm1  ;;  %vm432_vm6 = vweird.f32 %v2287_v13  ;;  %v438_v7 = vand.u32 2147483648, %v2287_v13 }
  0xf3   :  { %1808 = vpow2.f32 %v1639_v17  ;;  %v400_v25 = vmul.f32 %v1797_v6, %v399_v19  ;;  %v414_v28 = vsub.f32 1.0, %v413_v21  ;;  %v2297_v29 = vadd.f32 1.0, %v1805_v23 }
  0xf4   :  { %1810 = vtanh.f32 %v202_v24  ;;  %v436_v10 = vand.u32 2147483647, %v2287_v13  ;;  %v439_v19 = vor.u32 1.1754944e-38, %v438_v7  ;;  %v211_v24 = vadd.f32 %v210_v42, %v2154_v47 }
  0xf5   :  { %v401_v32 = vadd.f32 %v1797_v6, %v400_v25  ;;  %1812 = vrcp.f32 %v2295_v26  ;;  %v415_v34 = vmul.f32 %v2289_v14, %v414_v28  ;;  %vm447_vm10 = vweird.f32 %v2295_v26 }
  0xf6   :  { %1814 = vrcp.f32 %v2297_v29  ;;  %vm437_vm9 = vcmp.eq.f32.partialorder %v436_v10, 8.507059e+37  ;;  %vm462_vm12 = vweird.f32 %v2297_v29  ;;  %v451_v40 = vand.u32 2147483647, %v2295_v26 }
  0xf7   :  { %v405_v48 = vsel %vm2311_vm15, %v1797_v6, %v401_v32  ;;  %v416_v51 = vadd.f32 %v2289_v14, %v415_v34  ;;  %1816 = vtanh.f32 %v205_v36  ;;  %v468_v41 = vand.u32 2147483648, %v2297_v29 }
  0xf8   :  { %v2299_v31 = vpop.eup %1806  ;;  %v2328_v59 = vsel %vm407_vm2, %v409_v54, %v405_v48  ;;  %v466_v44 = vand.u32 2147483647, %v2297_v29  ;;  %vm452_vm15 = vcmp.eq.f32.partialorder %v451_v40, 8.507059e+37  ;;  %v674_v48 = vld [vmem:[%s2793_s2 + $0x70] sm:$0xff] }
  0xf9   :  { %v1809_v35 = vpop.eup %1808  ;;  %v428_v38 = vmul.f32 %v2299_v31, %v2287_v13  ;;  %v420_v62 = vsel %vm2332_vm4, %v2289_v14, %v416_v51  ;;  %vm433_vm7 = vweird.f32 %v2299_v31  ;;  %v469_v55 = vor.u32 1.1754944e-38, %v468_v41  ;;  %771 = vmatpush.msrb.mxu2 %v674_v48 }
  0xfa   :  { %v2316_v45 = vadd.f32 1.0, %v1809_v35  ;;  %v1811_v46 = vpop.eup %1810  ;;  %v2350_v6 = vsel %vm422_vm5, %v424_v3, %v420_v62  ;;  %vm2359_vm8 = vmor %vm432_vm6, %vm433_vm7  ;;  %vm467_vm1 = vcmp.eq.f32.partialorder %v466_v44, 8.507059e+37 }
  0xfb   :  { %v429_v52 = vsub.f32 1.0, %v428_v38  ;;  %v2321_v53 = vpop.eup %1812  ;;  %v555_v61 = vmul.f32 %v1811_v46, %v2328_v59 }
  0xfc   :  { %v2324_v56 = vpop.eup %1814  ;;  %1818 = vrcp.f32 %v2316_v45  ;;  %v443_v63 = vmul.f32 %v2321_v53, %v2295_v26  ;;  %vm448_vm11 = vweird.f32 %v2321_v53  ;;  %vm477_vm2 = vweird.f32 %v2316_v45 }
  0xfd   :  { %v430_v0 = vmul.f32 %v2299_v31, %v429_v52  ;;  %v458_v30 = vmul.f32 %v2324_v56, %v2297_v29  ;;  %v1817_v5 = vpop.eup %1816  ;;  %1820 = vpow2.f32 %v1640_v58  ;;  %vm463_vm13 = vweird.f32 %v2324_v56  ;;  %vm2389_vm0 = vmor %vm447_vm10, %vm448_vm11 }
  0xfe   :  { %1822 = vtanh.f32 %v555_v61  ;;  %v444_v8 = vsub.f32 1.0, %v443_v63  ;;  %v556_v12 = vmul.f32 %v1817_v5, %v2350_v6  ;;  %vm2396_vm14 = vmor %vm462_vm12, %vm463_vm13  ;;  %v483_v63 = vand.u32 2147483648, %v2316_v45 }
  0xff   :  { %v431_v9 = vadd.f32 %v2299_v31, %v430_v0  ;;  %v459_v14 = vsub.f32 1.0, %v458_v30  ;;  %1824 = vtanh.f32 %v208_v39  ;;  %v481_v3 = vand.u32 2147483647, %v2316_v45  ;;  %v661_v39 = vld [vmem:[%s2793_s2 + $0x8] sm:$0xff] }
 0x100   :  { %v445_v22 = vmul.f32 %v2321_v53, %v444_v8  ;;  %1826 = vtanh.f32 %v556_v12  ;;  %v484_v7 = vor.u32 1.1754944e-38, %v483_v63  ;;  %v665_v63 = vld [vmem:[%s2793_s2 + $0x28] sm:$0xff] }
 0x101   :  { %v435_v21 = vsel %vm2359_vm8, %v2299_v31, %v431_v9  ;;  %v460_v28 = vmul.f32 %v2324_v56, %v459_v14  ;;  %v453_v31 = vand.u32 2147483648, %v2295_v26  ;;  %1828 = vtanh.f32 %v211_v24 }
 0x102   :  { %v2356_v11 = vpop.eup %1818  ;;  %v2376_v36 = vsel %vm437_vm9, %v439_v19, %v435_v21  ;;  %v446_v38 = vadd.f32 %v2321_v53, %v445_v22  ;;  %vm482_vm5 = vcmp.eq.f32.partialorder %v481_v3, 8.507059e+37 }
 0x103   :  { %v1821_v20 = vpop.eup %1820  ;;  %v473_v13 = vmul.f32 %v2356_v11, %v2316_v45  ;;  %v461_v43 = vadd.f32 %v2324_v56, %v460_v28  ;;  %v454_v54 = vor.u32 1.1754944e-38, %v453_v31  ;;  %vm478_vm3 = vweird.f32 %v2356_v11 }
 0x104   :  { %v1823_v32 = vpop.eup %1822  ;;  %v450_v26 = vsel %vm2389_vm0, %v2321_v53, %v446_v38  ;;  %vm2421_vm4 = vmor %vm477_vm2, %vm478_vm3 }
 0x105   :  { %v1825_v35 = vpop.eup %1824  ;;  %v474_v34 = vsub.f32 1.0, %v473_v13  ;;  %v465_v58 = vsel %vm2396_vm14, %v2324_v56, %v461_v43  ;;  %v2412_v62 = vsel %vm452_vm15, %v454_v54, %v450_v26  ;;  %v670_v54 = vld [vmem:[%s2793_s2 + $0x50] sm:$0xff]  ;;  %v671_v26 = vld [vmem:[%s2793_s2 + $0x58] sm:$0xff]  ;;  %vm730_vm15 = vcmask 523264  }
 0x106   :  { %v557_v46 = vmul.f32 %v1825_v35, %v2376_v36  ;;  %v1827_v52 = vpop.eup %1826 }
 0x107   :  { %v475_v29 = vmul.f32 %v2356_v11, %v474_v34  ;;  %v1829_v53 = vpop.eup %1828 }
 0x127   :  { %v597_v2 = vpop.permute.xlu0 %596 }
 0x128   :  { %v644_v4 = vmul.f32 %v597_v2, %v2183_v15  ;;  %v213_v15 = vpop.f32.mrf.mxu1  ;;  %v2417_v2 = vsel %vm467_vm1, %v469_v55, %v465_v58  ;;  %v669_v58 = vld [vmem:[%s2793_s2 + $0x48] sm:$0xff] }
 0x129   :  { %v214_v33 = vadd.f32 %v213_v15, %v2154_v47 }
 0x12a   :  { %698 = vrot.lane.b32.xlu0 %v644_v4, %s2020_s30  ;;  %v558_v4 = vmul.f32 %v1829_v53, %v2412_v62  ;;  %v664_v53 = vld [vmem:[%s2793_s2 + $0x20] sm:$0xff] }
 0x12b   :  { %1830 = vtanh.f32 %v214_v33 }
 0x12f   :  { %v599_v23 = vpop.permute.xlu0 %598  ;;  %v605_v0 = vpop.permute.xlu2 %604 }
 0x130   :  { %v645_v25 = vmul.f32 %v599_v23, %v2195_v27  ;;  %v2382_v27 = vadd.f32 1.0, %v1821_v20  ;;  %v216_v51 = vpop.f32.mrf.mxu1  ;;  %v648_v12 = vmul.f32 %v605_v0, %v2241_v18 }
 0x131   :  { %v217_v61 = vadd.f32 %v216_v51, %v2154_v47  ;;  %v1831_v56 = vpop.eup %1830  ;;  %v672_v51 = vld [vmem:[%s2793_s2 + $0x60] sm:$0xff] }
 0x132   :  { %610 = vrot.lane.b32.xlu0 %v1823_v32, %s2020_s30  ;;  %700 = vrot.lane.b32.xlu2 %v645_v25, %s2020_s30  ;;  %1832 = vrcp.f32 %v2382_v27  ;;  %v559_v5 = vmul.f32 %v1831_v56, %v2417_v2  ;;  %vm492_vm6 = vweird.f32 %v2382_v27  ;;  %v498_v24 = vand.u32 2147483648, %v2382_v27  ;;  %v662_v56 = vld [vmem:[%s2793_s2 + $0x10] sm:$0xff] }
 0x133   :  { %1834 = vtanh.f32 %v557_v46  ;;  %v496_v28 = vand.u32 2147483647, %v2382_v27  ;;  %772 = vmatpush.msrb.mxu2 %v672_v51 }
 0x134   :  { %1836 = vtanh.f32 %v217_v61  ;;  %v666_v61 = vld [vmem:[%s2793_s2 + $0x30] sm:$0xff] }
 0x135   :  { %1838 = vtanh.f32 %v558_v4  ;;  %vm497_vm9 = vcmp.eq.f32.partialorder %v496_v28, 8.507059e+37  ;;  %773 = vmatpush.msrb.mxu2 %v670_v54 }
 0x136   :  { %1840 = vtanh.f32 %v559_v5 }
 0x137   :  { %v601_v57 = vpop.permute.xlu1 %600  ;;  %v607_v20 = vpop.permute.xlu2 %606 }
 0x138   :  { %v646_v60 = vmul.f32 %v601_v57, %v2216_v49  ;;  %v476_v49 = vadd.f32 %v2356_v11, %v475_v29  ;;  %v1833_v30 = vpop.eup %1832  ;;  %v219_v21 = vpop.f32.mrf.mxu1  ;;  %v649_v18 = vmul.f32 %v607_v20, %v2254_v37  ;;  %v499_v37 = vor.u32 1.1754944e-38, %v498_v24  ;;  %v668_v29 = vld [vmem:[%s2793_s2 + $0x40] sm:$0xff] }
 0x139   :  { %v1835_v8 = vpop.eup %1834  ;;  %v488_v9 = vmul.f32 %v1833_v30, %v2382_v27  ;;  %v220_v23 = vadd.f32 %v219_v21, %v2154_v47  ;;  %vm493_vm7 = vweird.f32 %v1833_v30  ;;  %v157_v34 = vpop.f32.mrf.mxu3  ;;  %774 = vmatpush.msrb.mxu2 %v668_v29 }
 0x13a   :  { %702 = vrot.lane.b32.xlu1 %v646_v60, %s2020_s30  ;;  %612 = vrot.lane.b32.xlu2 %v1827_v52, %s2020_s30  ;;  %v480_v10 = vsel %vm2421_vm4, %v2356_v11, %v476_v49  ;;  %v1837_v14 = vpop.eup %1836  ;;  %vm494_vm8 = vmor %vm492_vm6, %vm493_vm7  ;;  %v673_v52 = vld [vmem:[%s2793_s2 + $0x68] sm:$0xff]  ;;  %v158_v57 = vadd.f32 %v157_v34, %v2119_v16  ;;  %v663_v49 = vld [vmem:[%s2793_s2 + $0x18] sm:$0xff] }
 0x13b   :  { %v2433_v17 = vsel %vm482_vm5, %v484_v7, %v480_v10  ;;  %v489_v19 = vsub.f32 1.0, %v488_v9  ;;  %v1839_v13 = vpop.eup %1838  ;;  %775 = vmatpush.msrb.mxu2 %v666_v61 }
 0x13c   :  { %v560_v11 = vmul.f32 %v1837_v14, %v2433_v17  ;;  %v1841_v22 = vpop.eup %1840  ;;  %v1641_v60 = vmul.f32 -1.442695, %v158_v57 }
 0x13d   :  { %776 = vmatpush.msrb.mxu2 %v664_v53 }
 0x13e   :  { %1842 = vtanh.f32 %v560_v11 }
 0x13f   :  { %v603_v45 = vpop.permute.xlu1 %602  ;;  %1844 = vtanh.f32 %v220_v23  ;;  %777 = vmatpush.msrb.mxu2 %v662_v56 }
 0x140   :  { %v647_v15 = vmul.f32 %v603_v45, %v2233_v1  ;;  %v490_v1 = vmul.f32 %v1833_v30, %v489_v19  ;;  %v222_v0 = vpop.f32.mrf.mxu1 }
 0x142   :  { %614 = vrot.lane.b32.xlu1 %v1835_v8, %s2020_s30  ;;  %704 = vrot.lane.b32.xlu0 %v647_v15, %s2020_s30  ;;  %v491_v25 = vadd.f32 %v1833_v30, %v490_v1 }
 0x143   :  { %706 = vrot.lane.b32.xlu2 %v648_v12, %s2020_s30  ;;  %v160_v27 = vpop.f32.mrf.mxu3 }
 0x144   :  { %v1843_v32 = vpop.eup %1842  ;;  %v495_v31 = vsel %vm494_vm8, %v1833_v30, %v491_v25  ;;  %v161_v42 = vadd.f32 %v160_v27, %v2119_v16  ;;  %v667_v16 = vld [vmem:[%s2793_s2 + $0x38] sm:$0xff]  ;;  %v660_v30 = vld [vmem:[%s2793_s2] sm:$0xff] }
 0x145   :  { %v1845_v33 = vpop.eup %1844  ;;  %v2447_v35 = vsel %vm497_vm9, %v499_v37, %v495_v31  ;;  %778 = vmatpush.msrb.mxu2 %v660_v30  ;;  %v223_v37 = vadd.f32 %v222_v0, %v2154_v47 }
 0x146   :  { %v561_v38 = vmul.f32 %v1845_v33, %v2447_v35  ;;  %v1642_v44 = vmul.f32 -1.442695, %v161_v42 }
 0x148   :  { %1846 = vtanh.f32 %v561_v38  ;;  %v225_v9 = vpop.f32.mrf.mxu1 }
 0x149   :  { %1848 = vpow2.f32 %v1642_v44  ;;  %v226_v45 = vadd.f32 %v225_v9, %v2154_v47 }
 0x14a   :  { %708 = vrot.lane.b32.xlu1 %v649_v18, %s2020_s30  ;;  %616 = vrot.lane.b32.xlu0 %v1839_v13, %s2020_s30 }
 0x14b   :  { %618 = vrot.lane.b32.xlu2 %v1841_v22, %s2020_s30 }
 0x14e   :  { %v1847_v43 = vpop.eup %1846 }
 0x14f   :  { %v1849_v46 = vpop.eup %1848 }
 0x150   :  { %v291_v55 = vadd.f32 1.0, %v1849_v46 }
 0x152   :  { %620 = vrot.lane.b32.xlu1 %v1843_v32, %s2020_s30  ;;  %1850 = vrcp.f32 %v291_v55  ;;  %vm522_vm10 = vweird.f32 %v291_v55  ;;  %v528_v15 = vand.u32 2147483648, %v291_v55  ;;  %v526_v14 = vand.u32 2147483647, %v291_v55 }
 0x153   :  { %1852 = vpow2.f32 %v1641_v60 }
 0x154   :  { %v529_v20 = vor.u32 1.1754944e-38, %v528_v15  ;;  %vm527_vm13 = vcmp.eq.f32.partialorder %v526_v14, 8.507059e+37 }
 0x157   :  { %v609_v40 = vpop.permute.xlu1 %608 }
 0x158   :  { %v650_v41 = vmul.f32 %v609_v40, %v2267_v50  ;;  %v675_v50 = vld [vmem:[%s2793_s2 + $0x78] sm:$0xff]  ;;  %v1851_v3 = vpop.eup %1850 }
 0x159   :  { %836 = vmatpush.msrb.mxu3 %v675_v50  ;;  %v518_v4 = vmul.f32 %v1851_v3, %v291_v55  ;;  %v1853_v5 = vpop.eup %1852  ;;  %vm523_vm11 = vweird.f32 %v1851_v3 }
 0x15a   :  { %710 = vrot.lane.b32.xlu0 %v650_v41, %s2020_s30  ;;  %v290_v8 = vadd.f32 1.0, %v1853_v5  ;;  %vm524_vm12 = vmor %vm522_vm10, %vm523_vm11 }
 0x15b   :  { %837 = vmatpush.msrb.mxu3 %v673_v52  ;;  %v519_v7 = vsub.f32 1.0, %v518_v4 }
 0x15c   :  { %1854 = vrcp.f32 %v290_v8  ;;  %vm507_vm0 = vweird.f32 %v290_v8  ;;  %v513_v32 = vand.u32 2147483648, %v290_v8  ;;  %v511_v33 = vand.u32 2147483647, %v290_v8 }
 0x15d   :  { %838 = vmatpush.msrb.mxu3 %v671_v26  ;;  %v520_v10 = vmul.f32 %v1851_v3, %v519_v7  ;;  %1856 = vtanh.f32 %v226_v45 }
 0x15e   :  { %v514_v40 = vor.u32 1.1754944e-38, %v513_v32  ;;  %vm512_vm2 = vcmp.eq.f32.partialorder %v511_v33, 8.507059e+37 }
 0x15f   :  { %839 = vmatpush.msrb.mxu3 %v669_v58  ;;  %v521_v12 = vadd.f32 %v1851_v3, %v520_v10 }
 0x161   :  { %840 = vmatpush.msrb.mxu3 %v667_v16  ;;  %v525_v11 = vsel %vm524_vm12, %v1851_v3, %v521_v12 }
 0x162   :  { %622 = vrot.lane.b32.xlu0 %v1847_v43, %s2020_s30  ;;  %v1855_v19 = vpop.eup %1854  ;;  %v2505_v22 = vsel %vm527_vm13, %v529_v20, %v525_v11 }
 0x163   :  { %841 = vmatpush.msrb.mxu3 %v665_v63  ;;  %v503_v13 = vmul.f32 %v1855_v19, %v290_v8  ;;  %v1857_v1 = vpop.eup %1856  ;;  %vm508_vm14 = vweird.f32 %v1855_v19 }
 0x164   :  { %v563_v23 = vmul.f32 %v1857_v1, %v2505_v22  ;;  %vm509_vm1 = vmor %vm507_vm0, %vm508_vm14 }
 0x165   :  { %842 = vmatpush.msrb.mxu3 %v663_v49  ;;  %v504_v18 = vsub.f32 1.0, %v503_v13 }
 0x166   :  { %1858 = vtanh.f32 %v563_v23 }
 0x167   :  { %843 = vmatpush.msrb.mxu3 %v661_v39  ;;  %v505_v28 = vmul.f32 %v1855_v19, %v504_v18  ;;  %1860 = vtanh.f32 %v223_v37 }
 0x169   :  { %v506_v31 = vadd.f32 %v1855_v19, %v505_v28 }
 0x16c   :  { %v1859_v34 = vpop.eup %1858 }
 0x16d   :  { %v1861_v47 = vpop.eup %1860 }
 0x18c   :  { %v701_v21 = vpop.permute.xlu2 %700 }
 0x194   :  { %v613_v24 = vpop.permute.xlu2 %612 }
 0x195   :  { %v652_v25 = vmul.f32 %v613_v24, %v2350_v6  ;;  %v510_v6 = vsel %vm509_vm1, %v1855_v19, %v506_v31 }
 0x196   :  { %v515_v41 = vsel %vm512_vm2, %v514_v40, %v510_v6 }
 0x197   :  { %714 = vrot.lane.b32.xlu1 %v652_v25, %s2020_s30  ;;  %v562_v27 = vmul.f32 %v1861_v47, %v515_v41 }
 0x199   :  { %1862 = vtanh.f32 %v562_v27 }
 0x19c   :  { %v699_v38 = vpop.permute.xlu0 %698 }
 0x19d   :  { %1643 = vmatmul.msk.f32.vlgmr.msrb.gmra.mxu2 %vm730_vm15, %v699_v38  ;;  %1659 = vmatmul.msk.f32.vlgmr.msrb.gmra.mxu3 %vm730_vm15, %v699_v38  ;;  %v707_v48 = vpop.permute.xlu2 %706 }
 0x19f   :  { %626 = vrot.lane.b32.xlu1 %v1859_v34, %s2020_s30  ;;  %v1863_v46 = vpop.eup %1862 }
 0x1a4   :  { %v611_v42 = vpop.permute.xlu0 %610 }
 0x1a5   :  { %v651_v43 = vmul.f32 %v611_v42, %v2328_v59  ;;  %1644 = vmatmul.msk.f32.gmra.mxu2 %vm730_vm15, %v701_v21  ;;  %1660 = vmatmul.msk.f32.gmra.mxu3 %vm730_vm15, %v701_v21  ;;  %v619_v52 = vpop.permute.xlu2 %618 }
 0x1a6   :  { %v655_v55 = vmul.f32 %v619_v52, %v2417_v2 }
 0x1a7   :  { %712 = vrot.lane.b32.xlu2 %v651_v43, %s2020_s30 }
 0x1ac   :  { %v703_v44 = vpop.permute.xlu1 %702 }
 0x1ad   :  { %1645 = vmatmul.msk.f32.gmra.mxu2 %vm730_vm15, %v703_v44  ;;  %1661 = vmatmul.msk.f32.gmra.mxu3 %vm730_vm15, %v703_v44 }
 0x1af   :  { %624 = vrot.lane.b32.xlu2 %v1863_v46, %s2020_s30 }
 0x1b4   :  { %v615_v50 = vpop.permute.xlu1 %614  ;;  %v705_v51 = vpop.permute.xlu0 %704 }
 0x1b5   :  { %v653_v59 = vmul.f32 %v615_v50, %v2376_v36  ;;  %1646 = vmatmul.msk.f32.gmra.mxu2 %vm730_vm15, %v705_v51  ;;  %1662 = vmatmul.msk.f32.gmra.mxu3 %vm730_vm15, %v705_v51 }
 0x1b7   :  { %716 = vrot.lane.b32.xlu0 %v653_v59, %s2020_s30 }
 0x1bc   :  { %v709_v54 = vpop.permute.xlu1 %708  ;;  %v617_v26 = vpop.permute.xlu0 %616 }
 0x1bd   :  { %v654_v57 = vmul.f32 %v617_v26, %v2412_v62  ;;  %1647 = vmatmul.msk.f32.gmra.mxu2 %vm730_vm15, %v707_v48  ;;  %1663 = vmatmul.msk.f32.gmra.mxu3 %vm730_vm15, %v707_v48 }
 0x1bf   :  { %720 = vrot.lane.b32.xlu0 %v655_v55, %s2020_s30  ;;  %718 = vrot.lane.b32.xlu2 %v654_v57, %s2020_s30 }
 0x1c4   :  { %v621_v36 = vpop.permute.xlu1 %620 }
 0x1c5   :  { %v656_v29 = vmul.f32 %v621_v36, %v2433_v17  ;;  %1648 = vmatmul.msk.f32.gmra.mxu2 %vm730_vm15, %v709_v54  ;;  %1664 = vmatmul.msk.f32.gmra.mxu3 %vm730_vm15, %v709_v54 }
 0x1c7   :  { %722 = vrot.lane.b32.xlu1 %v656_v29, %s2020_s30 }
 0x1cc   :  { %v711_v2 = vpop.permute.xlu0 %710 }
 0x1cd   :  { %1649 = vmatmul.msk.f32.gmra.mxu2 %vm730_vm15, %v711_v2  ;;  %1665 = vmatmul.msk.f32.gmra.mxu3 %vm730_vm15, %v711_v2 }
 0x1d4   :  { %v623_v62 = vpop.permute.xlu0 %622 }
 0x1d5   :  { %v657_v58 = vmul.f32 %v623_v62, %v2447_v35  ;;  %v1992_v35 = vld [vmem:[%s2795_s4] sm:$0xff] }
 0x1d6   :  { %v676_v56 = vperm.slane %v1992_v35, 1  ;;  %v677_v45 = vperm.slane %v1992_v35, 5 }
 0x1d7   :  { %724 = vrot.lane.b32.xlu2 %v657_v58, %s2020_s30 }
 0x1d8   :  { %v2549_v0 = vperm.slane %v676_v56, 1  ;;  %v2555_v12 = vperm.slane %v677_v45, 1 }
 0x201   :  { %v713_v60 = vpop.permute.xlu2 %712 }
 0x202   :  { %1650 = vmatmul.msk.f32.gmra.mxu2 %vm730_vm15, %v713_v60  ;;  %1666 = vmatmul.msk.f32.gmra.mxu3 %vm730_vm15, %v713_v60 }
 0x209   :  { %v715_v17 = vpop.permute.xlu1 %714  ;;  %v625_v61 = vpop.permute.xlu2 %624 }
 0x20a   :  { %v658_v16 = vmul.f32 %v625_v61, %v515_v41  ;;  %1651 = vmatmul.msk.f32.gmra.mxu2 %vm730_vm15, %v715_v17  ;;  %1667 = vmatmul.msk.f32.gmra.mxu3 %vm730_vm15, %v715_v17 }
 0x20c   :  { %726 = vrot.lane.b32.xlu0 %v658_v16, %s2020_s30 }
 0x211   :  { %v627_v53 = vpop.permute.xlu1 %626 }
 0x212   :  { %v659_v63 = vmul.f32 %v627_v53, %v2505_v22 }
 0x214   :  { %728 = vrot.lane.b32.xlu1 %v659_v63, %s2020_s30 }
 0x219   :  { %v719_v19 = vpop.permute.xlu2 %718 }
 0x220   :  { %v780_v49 = vpop.f32.mrf.mxu2  ;;  %v845_v39 = vpop.f32.mrf.mxu3 }
 0x221   :  { %v781_v3 = vadd.f32 %v780_v49, %v2549_v0  ;;  %v846_v1 = vadd.f32 %v845_v39, %v2555_v12 }
 0x223   :  { %v1675_v30 = vmul.f32 -1.442695, %v781_v3 }
 0x225   :  { %1864 = vpow2.f32 %v1675_v30 }
 0x228   :  { %v783_v4 = vpop.f32.mrf.mxu2  ;;  %v848_v15 = vpop.f32.mrf.mxu3 }
 0x229   :  { %v784_v5 = vadd.f32 %v783_v4, %v2549_v0  ;;  %v717_v7 = vpop.permute.xlu0 %716  ;;  %v849_v41 = vadd.f32 %v848_v15, %v2555_v12 }
 0x22a   :  { %1652 = vmatmul.msk.f32.gmra.mxu2 %vm730_vm15, %v717_v7  ;;  %1668 = vmatmul.msk.f32.gmra.mxu3 %vm730_vm15, %v717_v7 }
 0x22b   :  { %v1865_v8 = vpop.eup %1864  ;;  %v1676_v9 = vmul.f32 -1.442695, %v784_v5 }
 0x22c   :  { %v941_v10 = vadd.f32 1.0, %v1865_v8 }
 0x22d   :  { %1866 = vpow2.f32 %v1676_v9 }
 0x22e   :  { %1868 = vrcp.f32 %v941_v10  ;;  %v968_v24 = vand.u32 2147483648, %v941_v10  ;;  %v966_v37 = vand.u32 2147483647, %v941_v10  ;;  %vm962_vm4 = vweird.f32 %v941_v10 }
 0x230   :  { %v786_v14 = vpop.f32.mrf.mxu2  ;;  %v851_v32 = vpop.f32.mrf.mxu3  ;;  %v969_v47 = vor.u32 1.1754944e-38, %v968_v24  ;;  %vm967_vm6 = vcmp.eq.f32.partialorder %v966_v37, 8.507059e+37 }
 0x231   :  { %v787_v20 = vadd.f32 %v786_v14, %v2549_v0  ;;  %v721_v31 = vpop.permute.xlu0 %720  ;;  %v852_v60 = vadd.f32 %v851_v32, %v2555_v12  ;;  %v725_v5 = vpop.permute.xlu2 %724 }
 0x232   :  { %1653 = vmatmul.msk.f32.gmra.mxu2 %vm730_vm15, %v719_v19  ;;  %1669 = vmatmul.msk.f32.gmra.mxu3 %vm730_vm15, %v719_v19 }
 0x233   :  { %v1867_v11 = vpop.eup %1866  ;;  %v1677_v21 = vmul.f32 -1.442695, %v787_v20 }
 0x234   :  { %v1869_v13 = vpop.eup %1868  ;;  %v942_v22 = vadd.f32 1.0, %v1867_v11 }
 0x235   :  { %v958_v18 = vmul.f32 %v1869_v13, %v941_v10  ;;  %1870 = vpow2.f32 %v1677_v21  ;;  %vm963_vm3 = vweird.f32 %v1869_v13 }
 0x236   :  { %1872 = vrcp.f32 %v942_v22  ;;  %vm964_vm5 = vmor %vm962_vm4, %vm963_vm3  ;;  %v981_v51 = vand.u32 2147483647, %v942_v22  ;;  %v983_v59 = vand.u32 2147483648, %v942_v22  ;;  %vm977_vm8 = vweird.f32 %v942_v22 }
 0x237   :  { %v959_v23 = vsub.f32 1.0, %v958_v18  ;;  %1874 = vtanh.f32 %v846_v1 }
 0x238   :  { %v789_v25 = vpop.f32.mrf.mxu2  ;;  %v854_v29 = vpop.f32.mrf.mxu3  ;;  %v984_v58 = vor.u32 1.1754944e-38, %v983_v59  ;;  %vm982_vm10 = vcmp.eq.f32.partialorder %v981_v51, 8.507059e+37 }
 0x239   :  { %v960_v28 = vmul.f32 %v1869_v13, %v959_v23  ;;  %v790_v33 = vadd.f32 %v789_v25, %v2549_v0  ;;  %v723_v26 = vpop.permute.xlu1 %722  ;;  %v855_v14 = vadd.f32 %v854_v29, %v2555_v12 }
 0x23a   :  { %1654 = vmatmul.msk.f32.gmra.mxu2 %vm730_vm15, %v721_v31  ;;  %1670 = vmatmul.msk.f32.gmra.mxu3 %vm730_vm15, %v721_v31 }
 0x23b   :  { %v1871_v34 = vpop.eup %1870  ;;  %v961_v38 = vadd.f32 %v1869_v13, %v960_v28  ;;  %v1678_v40 = vmul.f32 -1.442695, %v790_v33 }
 0x23c   :  { %v1873_v6 = vpop.eup %1872  ;;  %v2565_v27 = vadd.f32 1.0, %v1871_v34 }
 0x23d   :  { %v965_v42 = vsel %vm964_vm5, %v1869_v13, %v961_v38  ;;  %v973_v43 = vmul.f32 %v1873_v6, %v942_v22  ;;  %1876 = vpow2.f32 %v1678_v40  ;;  %v1875_v44 = vpop.eup %1874  ;;  %vm978_vm7 = vweird.f32 %v1873_v6 }
 0x23e   :  { %v2567_v46 = vsel %vm967_vm6, %v969_v47, %v965_v42  ;;  %1878 = vrcp.f32 %v2565_v27  ;;  %vm979_vm9 = vmor %vm977_vm8, %vm978_vm7  ;;  %v996_v3 = vand.u32 2147483647, %v2565_v27  ;;  %v998_v30 = vand.u32 2147483648, %v2565_v27 }
 0x23f   :  { %v1213_v48 = vmul.f32 %v1875_v44, %v2567_v46  ;;  %v974_v50 = vsub.f32 1.0, %v973_v43  ;;  %1880 = vtanh.f32 %v849_v41  ;;  %vm992_vm12 = vweird.f32 %v2565_v27 }
 0x240   :  { %v792_v52 = vpop.f32.mrf.mxu2  ;;  %v999_v15 = vor.u32 1.1754944e-38, %v998_v30  ;;  %vm997_vm0 = vcmp.eq.f32.partialorder %v996_v3, 8.507059e+37  ;;  %v857_v21 = vpop.f32.mrf.mxu3 }
 0x241   :  { %1882 = vtanh.f32 %v1213_v48  ;;  %v975_v54 = vmul.f32 %v1873_v6, %v974_v50  ;;  %v793_v55 = vadd.f32 %v792_v52, %v2549_v0 }
 0x242   :  { %1655 = vmatmul.msk.f32.gmra.mxu2 %vm730_vm15, %v723_v26  ;;  %1671 = vmatmul.msk.f32.gmra.mxu3 %vm730_vm15, %v723_v26 }
 0x243   :  { %v1877_v57 = vpop.eup %1876  ;;  %v976_v36 = vadd.f32 %v1873_v6, %v975_v54  ;;  %v1679_v2 = vmul.f32 -1.442695, %v793_v55 }
 0x244   :  { %v1879_v62 = vpop.eup %1878  ;;  %v2575_v17 = vadd.f32 1.0, %v1877_v57 }
 0x245   :  { %v980_v61 = vsel %vm979_vm9, %v1873_v6, %v976_v36  ;;  %v988_v16 = vmul.f32 %v1879_v62, %v2565_v27  ;;  %1884 = vpow2.f32 %v1679_v2  ;;  %v1881_v53 = vpop.eup %1880  ;;  %vm993_vm11 = vweird.f32 %v1879_v62 }
 0x246   :  { %v2578_v63 = vsel %vm982_vm10, %v984_v58, %v980_v61  ;;  %1886 = vrcp.f32 %v2575_v17  ;;  %vm994_vm13 = vmor %vm992_vm12, %vm993_vm11  ;;  %v1011_v24 = vand.u32 2147483647, %v2575_v17  ;;  %v1013_v25 = vand.u32 2147483648, %v2575_v17 }
 0x247   :  { %v1883_v35 = vpop.eup %1882  ;;  %v1214_v56 = vmul.f32 %v1881_v53, %v2578_v63  ;;  %v989_v49 = vsub.f32 1.0, %v988_v16  ;;  %1888 = vtanh.f32 %v852_v60  ;;  %vm1007_vm1 = vweird.f32 %v2575_v17 }
 0x248   :  { %v795_v39 = vpop.f32.mrf.mxu2  ;;  %1261 = vrot.lane.b32.xlu2 %v1883_v35, %s2020_s30  ;;  %v1014_v40 = vor.u32 1.1754944e-38, %v1013_v25  ;;  %v858_v6 = vadd.f32 %v857_v21, %v2555_v12  ;;  %vm1012_vm3 = vcmp.eq.f32.partialorder %v1011_v24, 8.507059e+37  ;;  %v860_v51 = vpop.f32.mrf.mxu3 }
 0x249   :  { %1890 = vtanh.f32 %v1214_v56  ;;  %v990_v4 = vmul.f32 %v1879_v62, %v989_v49  ;;  %v796_v7 = vadd.f32 %v795_v39, %v2549_v0  ;;  %v861_v29 = vadd.f32 %v860_v51, %v2555_v12 }
 0x24a   :  { %1656 = vmatmul.msk.f32.gmra.mxu2 %vm730_vm15, %v725_v5  ;;  %1672 = vmatmul.msk.f32.gmra.mxu3 %vm730_vm15, %v725_v5 }
 0x24b   :  { %v1885_v8 = vpop.eup %1884  ;;  %v991_v9 = vadd.f32 %v1879_v62, %v990_v4  ;;  %v1680_v10 = vmul.f32 -1.442695, %v796_v7 }
 0x24c   :  { %v1887_v45 = vpop.eup %1886  ;;  %v945_v19 = vadd.f32 1.0, %v1885_v8 }
 0x24d   :  { %v995_v20 = vsel %vm994_vm13, %v1879_v62, %v991_v9  ;;  %v1003_v11 = vmul.f32 %v1887_v45, %v2575_v17  ;;  %1892 = vpow2.f32 %v1680_v10  ;;  %v1889_v13 = vpop.eup %1888  ;;  %vm1008_vm14 = vweird.f32 %v1887_v45 }
 0x24e   :  { %v2591_v1 = vsel %vm997_vm0, %v999_v15, %v995_v20  ;;  %1894 = vrcp.f32 %v945_v19  ;;  %vm1009_vm2 = vmor %vm1007_vm1, %vm1008_vm14  ;;  %v1028_v59 = vand.u32 2147483648, %v945_v19  ;;  %v1026_v54 = vand.u32 2147483647, %v945_v19 }
 0x24f   :  { %v1891_v22 = vpop.eup %1890  ;;  %v1215_v18 = vmul.f32 %v1889_v13, %v2591_v1  ;;  %v1004_v23 = vsub.f32 1.0, %v1003_v11  ;;  %1896 = vtanh.f32 %v855_v14  ;;  %vm1022_vm5 = vweird.f32 %v945_v19 }
 0x250   :  { %1263 = vrot.lane.b32.xlu0 %v1891_v22, %s2020_s30  ;;  %v798_v28 = vpop.f32.mrf.mxu2  ;;  %v1029_v36 = vor.u32 1.1754944e-38, %v1028_v59  ;;  %vm1027_vm7 = vcmp.eq.f32.partialorder %v1026_v54, 8.507059e+37  ;;  %v863_v3 = vpop.f32.mrf.mxu3 }
 0x251   :  { %1898 = vtanh.f32 %v1215_v18  ;;  %v1005_v37 = vmul.f32 %v1887_v45, %v1004_v23  ;;  %v799_v32 = vadd.f32 %v798_v28, %v2549_v0  ;;  %v864_v5 = vadd.f32 %v863_v3, %v2555_v12 }
 0x253   :  { %v1893_v31 = vpop.eup %1892  ;;  %v1006_v33 = vadd.f32 %v1887_v45, %v1005_v37  ;;  %v1681_v34 = vmul.f32 -1.442695, %v799_v32 }
 0x254   :  { %v1895_v38 = vpop.eup %1894  ;;  %v946_v47 = vadd.f32 1.0, %v1893_v31 }
 0x255   :  { %v1010_v41 = vsel %vm1009_vm2, %v1887_v45, %v1006_v33  ;;  %v1018_v27 = vmul.f32 %v1895_v38, %v945_v19  ;;  %1900 = vpow2.f32 %v1681_v34  ;;  %v1897_v42 = vpop.eup %1896  ;;  %vm1023_vm4 = vweird.f32 %v1895_v38 }
 0x256   :  { %v2600_v43 = vsel %vm1012_vm3, %v1014_v40, %v1010_v41  ;;  %1902 = vrcp.f32 %v946_v47  ;;  %vm1024_vm6 = vmor %vm1022_vm5, %vm1023_vm4  ;;  %v1043_v35 = vand.u32 2147483648, %v946_v47  ;;  %v1041_v49 = vand.u32 2147483647, %v946_v47 }
 0x257   :  { %v1899_v44 = vpop.eup %1898  ;;  %v1216_v48 = vmul.f32 %v1897_v42, %v2600_v43  ;;  %v1019_v50 = vsub.f32 1.0, %v1018_v27  ;;  %1904 = vtanh.f32 %v858_v6  ;;  %vm1037_vm9 = vweird.f32 %v946_v47 }
 0x258   :  { %1265 = vrot.lane.b32.xlu1 %v1899_v44, %s2020_s30  ;;  %v1044_v4 = vor.u32 1.1754944e-38, %v1043_v35  ;;  %vm1042_vm11 = vcmp.eq.f32.partialorder %v1041_v49, 8.507059e+37 }
 0x259   :  { %1906 = vtanh.f32 %v1216_v48  ;;  %v1020_v52 = vmul.f32 %v1895_v38, %v1019_v50 }
 0x25b   :  { %v1901_v26 = vpop.eup %1900  ;;  %v1021_v55 = vadd.f32 %v1895_v38, %v1020_v52 }
 0x25c   :  { %v1903_v57 = vpop.eup %1902  ;;  %v947_v2 = vadd.f32 1.0, %v1901_v26 }
 0x25d   :  { %v1025_v62 = vsel %vm1024_vm6, %v1895_v38, %v1021_v55  ;;  %v1033_v58 = vmul.f32 %v1903_v57, %v946_v47  ;;  %v1905_v60 = vpop.eup %1904  ;;  %vm1038_vm8 = vweird.f32 %v1903_v57 }
 0x25e   :  { %v2605_v17 = vsel %vm1027_vm7, %v1029_v36, %v1025_v62  ;;  %1908 = vrcp.f32 %v947_v2  ;;  %vm1039_vm10 = vmor %vm1037_vm9, %vm1038_vm8  ;;  %v1058_v19 = vand.u32 2147483648, %v947_v2  ;;  %v1056_v11 = vand.u32 2147483647, %v947_v2 }
 0x25f   :  { %v1907_v61 = vpop.eup %1906  ;;  %v1217_v16 = vmul.f32 %v1905_v60, %v2605_v17  ;;  %v1034_v53 = vsub.f32 1.0, %v1033_v58  ;;  %1910 = vtanh.f32 %v861_v29  ;;  %vm1052_vm13 = vweird.f32 %v947_v2 }
 0x260   :  { %1267 = vrot.lane.b32.xlu2 %v1907_v61, %s2020_s30  ;;  %v1059_v13 = vor.u32 1.1754944e-38, %v1058_v19  ;;  %vm1057_vm14 = vcmp.eq.f32.partialorder %v1056_v11, 8.507059e+37 }
 0x261   :  { %1912 = vtanh.f32 %v1217_v16  ;;  %v1035_v56 = vmul.f32 %v1903_v57, %v1034_v53 }
 0x262   :  { %1914 = vtanh.f32 %v864_v5 }
 0x263   :  { %v1036_v30 = vadd.f32 %v1903_v57, %v1035_v56 }
 0x264   :  { %v1909_v39 = vpop.eup %1908 }
 0x265   :  { %v1040_v7 = vsel %vm1039_vm10, %v1903_v57, %v1036_v30  ;;  %v1048_v8 = vmul.f32 %v1909_v39, %v947_v2  ;;  %v1911_v9 = vpop.eup %1910  ;;  %vm1053_vm12 = vweird.f32 %v1909_v39 }
 0x266   :  { %v2610_v10 = vsel %vm1042_vm11, %v1044_v4, %v1040_v7  ;;  %vm1054_vm0 = vmor %vm1052_vm13, %vm1053_vm12 }
 0x267   :  { %v1913_v45 = vpop.eup %1912  ;;  %v1218_v15 = vmul.f32 %v1911_v9, %v2610_v10  ;;  %v1049_v14 = vsub.f32 1.0, %v1048_v8 }
 0x268   :  { %1269 = vrot.lane.b32.xlu0 %v1913_v45, %s2020_s30  ;;  %v1915_v18 = vpop.eup %1914 }
 0x269   :  { %1916 = vtanh.f32 %v1218_v15  ;;  %v1050_v20 = vmul.f32 %v1909_v39, %v1049_v14 }
 0x26b   :  { %v1051_v21 = vadd.f32 %v1909_v39, %v1050_v20 }
 0x26d   :  { %v1055_v22 = vsel %vm1054_vm0, %v1909_v39, %v1051_v21 }
 0x26e   :  { %v2614_v23 = vsel %vm1057_vm14, %v1059_v13, %v1055_v22 }
 0x26f   :  { %v1917_v24 = vpop.eup %1916  ;;  %v1219_v25 = vmul.f32 %v1915_v18, %v2614_v23 }
 0x270   :  { %1271 = vrot.lane.b32.xlu1 %v1917_v24, %s2020_s30 }
 0x271   :  { %1918 = vtanh.f32 %v1219_v25 }
 0x277   :  { %v1919_v28 = vpop.eup %1918 }
 0x278   :  { %1273 = vrot.lane.b32.xlu0 %v1919_v28, %s2020_s30 }
 0x27e   :  { %v727_v37 = vpop.permute.xlu0 %726 }
 0x27f   :  { %1657 = vmatmul.msk.f32.gmra.mxu2 %vm730_vm15, %v727_v37  ;;  %1673 = vmatmul.msk.f32.gmra.mxu3 %vm730_vm15, %v727_v37 }
 0x285   :  { %v801_v32 = vpop.f32.mrf.mxu2  ;;  %v866_v27 = vpop.f32.mrf.mxu3 }
 0x286   :  { %v802_v31 = vadd.f32 %v801_v32, %v2549_v0  ;;  %v729_v33 = vpop.permute.xlu1 %728  ;;  %v867_v44 = vadd.f32 %v866_v27, %v2555_v12 }
 0x287   :  { %1658 = vmatmul.msk.f32.gmra.mxu2 %vm730_vm15, %v729_v33  ;;  %1674 = vmatmul.msk.f32.gmra.mxu3 %vm730_vm15, %v729_v33 }
 0x288   :  { %v1682_v34 = vmul.f32 -1.442695, %v802_v31 }
 0x28a   :  { %1920 = vpow2.f32 %v1682_v34 }
 0x28d   :  { %v804_v38 = vpop.f32.mrf.mxu2  ;;  %v869_v56 = vpop.f32.mrf.mxu3 }
 0x28e   :  { %v805_v40 = vadd.f32 %v804_v38, %v2549_v0  ;;  %v870_v8 = vadd.f32 %v869_v56, %v2555_v12 }
 0x290   :  { %v1921_v6 = vpop.eup %1920  ;;  %v1683_v41 = vmul.f32 -1.442695, %v805_v40 }
 0x291   :  { %v948_v47 = vadd.f32 1.0, %v1921_v6 }
 0x293   :  { %1922 = vrcp.f32 %v948_v47  ;;  %v1073_v59 = vand.u32 2147483648, %v948_v47  ;;  %v1071_v54 = vand.u32 2147483647, %v948_v47  ;;  %vm1067_vm2 = vweird.f32 %v948_v47 }
 0x294   :  { %1924 = vpow2.f32 %v1683_v41 }
 0x295   :  { %1926 = vtanh.f32 %v867_v44  ;;  %v1074_v57 = vor.u32 1.1754944e-38, %v1073_v59  ;;  %vm1072_vm4 = vcmp.eq.f32.partialorder %v1071_v54, 8.507059e+37 }
 0x299   :  { %v1923_v42 = vpop.eup %1922 }
 0x29a   :  { %v1063_v48 = vmul.f32 %v1923_v42, %v948_v47  ;;  %v1925_v51 = vpop.eup %1924  ;;  %vm1068_vm1 = vweird.f32 %v1923_v42 }
 0x29b   :  { %v949_v55 = vadd.f32 1.0, %v1925_v51  ;;  %vm1069_vm3 = vmor %vm1067_vm2, %vm1068_vm1  ;;  %v1927_v2 = vpop.eup %1926 }
 0x29c   :  { %v1064_v50 = vsub.f32 1.0, %v1063_v48 }
 0x29d   :  { %1928 = vrcp.f32 %v949_v55  ;;  %v1088_v14 = vand.u32 2147483648, %v949_v55  ;;  %vm1082_vm6 = vweird.f32 %v949_v55  ;;  %v1086_v20 = vand.u32 2147483647, %v949_v55 }
 0x29e   :  { %v1065_v52 = vmul.f32 %v1923_v42, %v1064_v50 }
 0x29f   :  { %v1089_v22 = vor.u32 1.1754944e-38, %v1088_v14  ;;  %vm1087_vm8 = vcmp.eq.f32.partialorder %v1086_v20, 8.507059e+37 }
 0x2a0   :  { %v1066_v26 = vadd.f32 %v1923_v42, %v1065_v52 }
 0x2a2   :  { %v1070_v36 = vsel %vm1069_vm3, %v1923_v42, %v1066_v26  ;;  %v1262_v29 = vpop.permute.xlu2 %1261 }
 0x2a3   :  { %v2626_v62 = vsel %vm1072_vm4, %v1074_v57, %v1070_v36  ;;  %v1309_v58 = vmul.f32 %v1262_v29, %v2567_v46  ;;  %v1929_v61 = vpop.eup %1928 }
 0x2a4   :  { %v1220_v60 = vmul.f32 %v1927_v2, %v2626_v62  ;;  %v1078_v53 = vmul.f32 %v1929_v61, %v949_v55  ;;  %vm1083_vm5 = vweird.f32 %v1929_v61 }
 0x2a5   :  { %1350 = vrot.lane.b32.xlu2 %v1309_v58, %s2020_s30  ;;  %vm1084_vm7 = vmor %vm1082_vm6, %vm1083_vm5 }
 0x2a6   :  { %1930 = vtanh.f32 %v1220_v60  ;;  %v1079_v30 = vsub.f32 1.0, %v1078_v53 }
 0x2a8   :  { %v1080_v39 = vmul.f32 %v1929_v61, %v1079_v30 }
 0x2aa   :  { %v1081_v45 = vadd.f32 %v1929_v61, %v1080_v39  ;;  %v1331_v39 = vld [vmem:[%s2794_s3 + $0x30] sm:$0xff] }
 0x2ac   :  { %v1931_v16 = vpop.eup %1930  ;;  %v1085_v21 = vsel %vm1084_vm7, %v1929_v61, %v1081_v45 }
 0x2ad   :  { %1275 = vrot.lane.b32.xlu2 %v1931_v16, %s2020_s30  ;;  %v807_v35 = vpop.f32.mrf.mxu2  ;;  %v872_v4 = vpop.f32.mrf.mxu3  ;;  %v2638_v25 = vsel %vm1087_vm8, %v1089_v22, %v1085_v21 }
 0x2ae   :  { %v808_v49 = vadd.f32 %v807_v35, %v2549_v0  ;;  %v873_v31 = vadd.f32 %v872_v4, %v2555_v12 }
 0x2b0   :  { %v1684_v3 = vmul.f32 -1.442695, %v808_v49 }
 0x2b2   :  { %1932 = vpow2.f32 %v1684_v3 }
 0x2b5   :  { %v810_v46 = vpop.f32.mrf.mxu2  ;;  %v875_v28 = vpop.f32.mrf.mxu3 }
 0x2b6   :  { %v811_v5 = vadd.f32 %v810_v46, %v2549_v0 }
 0x2b8   :  { %v1933_v7 = vpop.eup %1932  ;;  %v1685_v9 = vmul.f32 -1.442695, %v811_v5 }
 0x2b9   :  { %v950_v15 = vadd.f32 1.0, %v1933_v7  ;;  %v1330_v7 = vld [vmem:[%s2794_s3 + $0x28] sm:$0xff] }
 0x2ba   :  { %1934 = vpow2.f32 %v1685_v9  ;;  %v1268_v19 = vpop.permute.xlu2 %1267 }
 0x2bb   :  { %1936 = vrcp.f32 %v950_v15  ;;  %v1312_v11 = vmul.f32 %v1268_v19, %v2600_v43  ;;  %v1103_v41 = vand.u32 2147483648, %v950_v15  ;;  %v1101_v44 = vand.u32 2147483647, %v950_v15 }
 0x2bc   :  { %1938 = vtanh.f32 %v870_v8  ;;  %vm1097_vm10 = vweird.f32 %v950_v15 }
 0x2bd   :  { %v813_v13 = vpop.f32.mrf.mxu2  ;;  %1356 = vrot.lane.b32.xlu2 %v1312_v11, %s2020_s30  ;;  %v1104_v54 = vor.u32 1.1754944e-38, %v1103_v41  ;;  %vm1102_vm12 = vcmp.eq.f32.partialorder %v1101_v44, 8.507059e+37  ;;  %v878_v36 = vpop.f32.mrf.mxu3  ;;  %v1326_v41 = vld [vmem:[%s2794_s3 + $0x8] sm:$0xff] }
 0x2be   :  { %v814_v18 = vadd.f32 %v813_v13, %v2549_v0  ;;  %v879_v45 = vadd.f32 %v878_v36, %v2555_v12 }
 0x2c0   :  { %v1935_v24 = vpop.eup %1934  ;;  %v1686_v37 = vmul.f32 -1.442695, %v814_v18 }
 0x2c1   :  { %v1937_v32 = vpop.eup %1936  ;;  %v2641_v33 = vadd.f32 1.0, %v1935_v24 }
 0x2c2   :  { %v1939_v34 = vpop.eup %1938  ;;  %v1093_v43 = vmul.f32 %v1937_v32, %v950_v15  ;;  %1940 = vpow2.f32 %v1686_v37  ;;  %v1264_v38 = vpop.permute.xlu0 %1263  ;;  %vm1098_vm9 = vweird.f32 %v1937_v32  ;;  %v1328_v37 = vld [vmem:[%s2794_s3 + $0x18] sm:$0xff] }
 0x2c3   :  { %v1221_v40 = vmul.f32 %v1939_v34, %v2638_v25  ;;  %1942 = vrcp.f32 %v2641_v33  ;;  %v1310_v47 = vmul.f32 %v1264_v38, %v2578_v63  ;;  %vm1099_vm11 = vmor %vm1097_vm10, %vm1098_vm9  ;;  %v876_v63 = vadd.f32 %v875_v28, %v2555_v12  ;;  %v1329_v28 = vld [vmem:[%s2794_s3 + $0x20] sm:$0xff] }
 0x2c4   :  { %v1094_v6 = vsub.f32 1.0, %v1093_v43  ;;  %1944 = vtanh.f32 %v873_v31  ;;  %v1116_v35 = vand.u32 2147483647, %v2641_v33  ;;  %v1118_v56 = vand.u32 2147483648, %v2641_v33 }
 0x2c5   :  { %v816_v27 = vpop.f32.mrf.mxu2  ;;  %1352 = vrot.lane.b32.xlu1 %v1310_v47, %s2020_s30  ;;  %1946 = vtanh.f32 %v1221_v40  ;;  %vm1112_vm0 = vweird.f32 %v2641_v33  ;;  %v881_v18 = vpop.f32.mrf.mxu3 }
 0x2c6   :  { %v1095_v42 = vmul.f32 %v1937_v32, %v1094_v6  ;;  %v817_v48 = vadd.f32 %v816_v27, %v2549_v0  ;;  %v1119_v9 = vor.u32 1.1754944e-38, %v1118_v56  ;;  %vm1117_vm1 = vcmp.eq.f32.partialorder %v1116_v35, 8.507059e+37 }
 0x2c7   :  { %v882_v6 = vadd.f32 %v881_v18, %v2555_v12 }
 0x2c8   :  { %v1941_v50 = vpop.eup %1940  ;;  %v1096_v51 = vadd.f32 %v1937_v32, %v1095_v42  ;;  %v1687_v59 = vmul.f32 -1.442695, %v817_v48 }
 0x2c9   :  { %v1943_v52 = vpop.eup %1942  ;;  %v2649_v26 = vadd.f32 1.0, %v1941_v50 }
 0x2ca   :  { %v1100_v55 = vsel %vm1099_vm11, %v1937_v32, %v1096_v51  ;;  %v1108_v57 = vmul.f32 %v1943_v52, %v2641_v33  ;;  %1948 = vpow2.f32 %v1687_v59  ;;  %v1266_v29 = vpop.permute.xlu1 %1265  ;;  %v1945_v2 = vpop.eup %1944  ;;  %vm1113_vm13 = vweird.f32 %v1943_v52  ;;  %v1327_v33 = vld [vmem:[%s2794_s3 + $0x10] sm:$0xff]  ;;  %v1325_v51 = vld [vmem:[%s2794_s3] sm:$0xff] }
 0x2cb   :  { %v2652_v58 = vsel %vm1102_vm12, %v1104_v54, %v1100_v55  ;;  %1950 = vrcp.f32 %v2649_v26  ;;  %v1311_v16 = vmul.f32 %v1266_v29, %v2591_v1  ;;  %v1947_v53 = vpop.eup %1946  ;;  %v1332_v1 = vld [vmem:[%s2794_s3 + $0x38] sm:$0xff]  ;;  %vm1114_vm14 = vmor %vm1112_vm0, %vm1113_vm13  ;;  %v1133_v24 = vand.u32 2147483648, %v2649_v26 }
 0x2cc   :  { %v1222_v60 = vmul.f32 %v1945_v2, %v2652_v58  ;;  %v1109_v61 = vsub.f32 1.0, %v1108_v57  ;;  %1952 = vtanh.f32 %v876_v63  ;;  %1422 = vmatpush.msrb.mxu0 %v1332_v1  ;;  %v1131_v31 = vand.u32 2147483647, %v2649_v26 }
 0x2cd   :  { %v819_v49 = vpop.f32.mrf.mxu2  ;;  %1354 = vrot.lane.b32.xlu0 %v1311_v16, %s2020_s30  ;;  %1277 = vrot.lane.b32.xlu1 %v1947_v53, %s2020_s30  ;;  %vm1127_vm3 = vweird.f32 %v2649_v26  ;;  %v1134_v40 = vor.u32 1.1754944e-38, %v1133_v24  ;;  %v884_v36 = vpop.f32.mrf.mxu3 }
 0x2ce   :  { %1954 = vtanh.f32 %v1222_v60  ;;  %v1110_v3 = vmul.f32 %v1943_v52, %v1109_v61  ;;  %v820_v30 = vadd.f32 %v819_v49, %v2549_v0  ;;  %1423 = vmatpush.msrb.mxu0 %v1331_v39  ;;  %vm1132_vm5 = vcmp.eq.f32.partialorder %v1131_v31, 8.507059e+37 }
 0x2cf   :  { %v885_v60 = vadd.f32 %v884_v36, %v2555_v12 }
 0x2d0   :  { %v1949_v46 = vpop.eup %1948  ;;  %v1111_v4 = vadd.f32 %v1943_v52, %v1110_v3  ;;  %v1688_v5 = vmul.f32 -1.442695, %v820_v30  ;;  %1424 = vmatpush.msrb.mxu0 %v1330_v7 }
 0x2d1   :  { %v1951_v8 = vpop.eup %1950  ;;  %v2673_v15 = vadd.f32 1.0, %v1949_v46 }
 0x2d2   :  { %v1115_v14 = vsel %vm1114_vm14, %v1943_v52, %v1111_v4  ;;  %v1123_v19 = vmul.f32 %v1951_v8, %v2649_v26  ;;  %1956 = vpow2.f32 %v1688_v5  ;;  %v1953_v20 = vpop.eup %1952  ;;  %vm1128_vm2 = vweird.f32 %v1951_v8  ;;  %1425 = vmatpush.msrb.mxu0 %v1329_v28 }
 0x2d3   :  { %v2676_v11 = vsel %vm1117_vm1, %v1119_v9, %v1115_v14  ;;  %1958 = vrcp.f32 %v2673_v15  ;;  %vm1129_vm4 = vmor %vm1127_vm3, %vm1128_vm2  ;;  %v1148_v26 = vand.u32 2147483648, %v2673_v15  ;;  %v1146_v57 = vand.u32 2147483647, %v2673_v15 }
 0x2d4   :  { %v1955_v21 = vpop.eup %1954  ;;  %v1223_v13 = vmul.f32 %v1953_v20, %v2676_v11  ;;  %v1124_v22 = vsub.f32 1.0, %v1123_v19  ;;  %1960 = vtanh.f32 %v879_v45  ;;  %1426 = vmatpush.msrb.mxu0 %v1328_v37  ;;  %vm1142_vm7 = vweird.f32 %v2673_v15 }
 0x2d5   :  { %1279 = vrot.lane.b32.xlu0 %v1955_v21, %s2020_s30  ;;  %vm1147_vm9 = vcmp.eq.f32.partialorder %v1146_v57, 8.507059e+37 }
 0x2d6   :  { %1962 = vtanh.f32 %v1223_v13  ;;  %v1125_v32 = vmul.f32 %v1951_v8, %v1124_v22  ;;  %1427 = vmatpush.msrb.mxu0 %v1327_v33 }
 0x2d8   :  { %v1957_v34 = vpop.eup %1956  ;;  %v1126_v43 = vadd.f32 %v1951_v8, %v1125_v32  ;;  %1428 = vmatpush.msrb.mxu0 %v1326_v41 }
 0x2d9   :  { %v1959_v38 = vpop.eup %1958  ;;  %v954_v47 = vadd.f32 1.0, %v1957_v34 }
 0x2da   :  { %v1130_v27 = vsel %vm1129_vm4, %v1951_v8, %v1126_v43  ;;  %v1138_v42 = vmul.f32 %v1959_v38, %v2673_v15  ;;  %v1270_v44 = vpop.permute.xlu0 %1269  ;;  %v1961_v48 = vpop.eup %1960  ;;  %vm1143_vm6 = vweird.f32 %v1959_v38  ;;  %1429 = vmatpush.msrb.mxu0 %v1325_v51 }
 0x2db   :  { %v2698_v50 = vsel %vm1132_vm5, %v1134_v40, %v1130_v27  ;;  %1964 = vrcp.f32 %v954_v47  ;;  %v1313_v63 = vmul.f32 %v1270_v44, %v2605_v17  ;;  %vm1144_vm8 = vmor %vm1142_vm7, %vm1143_vm6  ;;  %v1149_v17 = vor.u32 1.1754944e-38, %v1148_v26 }
 0x2dc   :  { %v1963_v59 = vpop.eup %1962  ;;  %v1224_v52 = vmul.f32 %v1961_v48, %v2698_v50  ;;  %v1139_v54 = vsub.f32 1.0, %v1138_v42  ;;  %1966 = vtanh.f32 %v882_v6  ;;  %v1163_v39 = vand.u32 2147483648, %v954_v47 }
 0x2dd   :  { %1281 = vrot.lane.b32.xlu2 %v1963_v59, %s2020_s30  ;;  %1358 = vrot.lane.b32.xlu1 %v1313_v63, %s2020_s30  ;;  %v1161_v4 = vand.u32 2147483647, %v954_v47  ;;  %vm1157_vm11 = vweird.f32 %v954_v47 }
 0x2de   :  { %1968 = vtanh.f32 %v1224_v52  ;;  %v1140_v55 = vmul.f32 %v1959_v38, %v1139_v54  ;;  %v1164_v7 = vor.u32 1.1754944e-38, %v1163_v39 }
 0x2df   :  { %1970 = vtanh.f32 %v885_v60  ;;  %vm1162_vm13 = vcmp.eq.f32.partialorder %v1161_v4, 8.507059e+37 }
 0x2e0   :  { %v1141_v29 = vadd.f32 %v1959_v38, %v1140_v55 }
 0x2e1   :  { %v1965_v2 = vpop.eup %1964 }
 0x2e2   :  { %v1145_v61 = vsel %vm1144_vm8, %v1959_v38, %v1141_v29  ;;  %v1153_v16 = vmul.f32 %v1965_v2, %v954_v47  ;;  %v1272_v53 = vpop.permute.xlu1 %1271  ;;  %v1967_v35 = vpop.eup %1966  ;;  %vm1158_vm10 = vweird.f32 %v1965_v2 }
 0x2e3   :  { %v2711_v56 = vsel %vm1147_vm9, %v1149_v17, %v1145_v61  ;;  %v1314_v49 = vmul.f32 %v1272_v53, %v2610_v10  ;;  %vm1159_vm12 = vmor %vm1157_vm11, %vm1158_vm10 }
 0x2e4   :  { %v1969_v3 = vpop.eup %1968  ;;  %v1225_v30 = vmul.f32 %v1967_v35, %v2711_v56  ;;  %v1154_v1 = vsub.f32 1.0, %v1153_v16 }
 0x2e5   :  { %1360 = vrot.lane.b32.xlu0 %v1314_v49, %s2020_s30  ;;  %1283 = vrot.lane.b32.xlu1 %v1969_v3, %s2020_s30  ;;  %v1971_v9 = vpop.eup %1970 }
 0x2e6   :  { %1972 = vtanh.f32 %v1225_v30  ;;  %v1155_v46 = vmul.f32 %v1965_v2, %v1154_v1 }
 0x2e8   :  { %v1156_v5 = vadd.f32 %v1965_v2, %v1155_v46 }
 0x2ea   :  { %v1160_v8 = vsel %vm1159_vm12, %v1965_v2, %v1156_v5  ;;  %v1274_v10 = vpop.permute.xlu0 %1273 }
 0x2eb   :  { %v2717_v45 = vsel %vm1162_vm13, %v1164_v7, %v1160_v8  ;;  %v1315_v15 = vmul.f32 %v1274_v10, %v2614_v23 }
 0x2ec   :  { %v1973_v14 = vpop.eup %1972  ;;  %v1226_v19 = vmul.f32 %v1971_v9, %v2717_v45 }
 0x2ed   :  { %1285 = vrot.lane.b32.xlu0 %v1973_v14, %s2020_s30  ;;  %1362 = vrot.lane.b32.xlu2 %v1315_v15, %s2020_s30 }
 0x2ee   :  { %1974 = vtanh.f32 %v1226_v19 }
 0x2f4   :  { %v1975_v20 = vpop.eup %1974 }
 0x2f5   :  { %1287 = vrot.lane.b32.xlu2 %v1975_v20, %s2020_s30 }
 0x2ff   :  { %v1351_v21 = vpop.permute.xlu2 %1350 }
 0x300   :  { %1691 = vmatmul.msk.f32.vlgmr.msrb.gmra.mxu0 %vm730_vm15, %v1351_v21 }
 0x302   :  { %v822_v13 = vpop.f32.mrf.mxu2  ;;  %v887_v34 = vpop.f32.mrf.mxu3 }
 0x303   :  { %v823_v22 = vadd.f32 %v822_v13, %v2549_v0  ;;  %v888_v38 = vadd.f32 %v887_v34, %v2555_v12 }
 0x305   :  { %v1689_v18 = vmul.f32 -1.442695, %v823_v22 }
 0x307   :  { %1976 = vpow2.f32 %v1689_v18  ;;  %v1276_v23 = vpop.permute.xlu2 %1275 }
 0x308   :  { %v1316_v24 = vmul.f32 %v1276_v23, %v2626_v62 }
 0x30a   :  { %v825_v28 = vpop.f32.mrf.mxu2  ;;  %1364 = vrot.lane.b32.xlu1 %v1316_v24, %s2020_s30  ;;  %v890_v36 = vpop.f32.mrf.mxu3 }
 0x30b   :  { %v826_v37 = vadd.f32 %v825_v28, %v2549_v0  ;;  %v891_v2 = vadd.f32 %v890_v36, %v2555_v12 }
 0x30d   :  { %v1977_v32 = vpop.eup %1976  ;;  %v1690_v33 = vmul.f32 -1.442695, %v826_v37 }
 0x30e   :  { %v955_v31 = vadd.f32 1.0, %v1977_v32 }
 0x310   :  { %1978 = vrcp.f32 %v955_v31  ;;  %v1178_v41 = vand.u32 2147483648, %v955_v31  ;;  %v1176_v27 = vand.u32 2147483647, %v955_v31  ;;  %vm1172_vm14 = vweird.f32 %v955_v31 }
 0x311   :  { %1980 = vpow2.f32 %v1690_v33 }
 0x312   :  { %1982 = vtanh.f32 %v888_v38  ;;  %v1179_v44 = vor.u32 1.1754944e-38, %v1178_v41  ;;  %vm1177_vm2 = vcmp.eq.f32.partialorder %v1176_v27, 8.507059e+37 }
 0x316   :  { %v1979_v43 = vpop.eup %1978 }
 0x317   :  { %v1168_v40 = vmul.f32 %v1979_v43, %v955_v31  ;;  %v1981_v47 = vpop.eup %1980  ;;  %vm1173_vm0 = vweird.f32 %v1979_v43  ;;  %v1357_v57 = vpop.permute.xlu2 %1356 }
 0x318   :  { %v956_v0 = vadd.f32 1.0, %v1981_v47  ;;  %vm1174_vm1 = vmor %vm1172_vm14, %vm1173_vm0  ;;  %v1983_v51 = vpop.eup %1982 }
 0x319   :  { %v1169_v6 = vsub.f32 1.0, %v1168_v40 }
 0x31a   :  { %1984 = vrcp.f32 %v956_v0  ;;  %v1193_v60 = vand.u32 2147483648, %v956_v0  ;;  %vm1187_vm4 = vweird.f32 %v956_v0  ;;  %v1191_v16 = vand.u32 2147483647, %v956_v0 }
 0x31b   :  { %v1170_v62 = vmul.f32 %v1979_v43, %v1169_v6 }
 0x31c   :  { %v1194_v3 = vor.u32 1.1754944e-38, %v1193_v60  ;;  %vm1192_vm6 = vcmp.eq.f32.partialorder %v1191_v16, 8.507059e+37 }
 0x31d   :  { %v1171_v42 = vadd.f32 %v1979_v43, %v1170_v62 }
 0x31f   :  { %v1175_v48 = vsel %vm1174_vm1, %v1979_v43, %v1171_v42 }
 0x320   :  { %v1180_v59 = vsel %vm1177_vm2, %v1179_v44, %v1175_v48  ;;  %v1985_v54 = vpop.eup %1984 }
 0x321   :  { %v1227_v52 = vmul.f32 %v1983_v51, %v1180_v59  ;;  %v1183_v26 = vmul.f32 %v1985_v54, %v956_v0  ;;  %vm1188_vm3 = vweird.f32 %v1985_v54 }
 0x322   :  { %vm1189_vm5 = vmor %vm1187_vm4, %vm1188_vm3 }
 0x323   :  { %1986 = vtanh.f32 %v1227_v52  ;;  %v1184_v55 = vsub.f32 1.0, %v1183_v26 }
 0x324   :  { %1988 = vtanh.f32 %v891_v2 }
 0x325   :  { %v1185_v29 = vmul.f32 %v1985_v54, %v1184_v55 }
 0x327   :  { %v1186_v17 = vadd.f32 %v1985_v54, %v1185_v29 }
 0x329   :  { %v1987_v63 = vpop.eup %1986  ;;  %v1190_v49 = vsel %vm1189_vm5, %v1985_v54, %v1186_v17 }
 0x32a   :  { %1289 = vrot.lane.b32.xlu1 %v1987_v63, %s2020_s30  ;;  %v1195_v30 = vsel %vm1192_vm6, %v1194_v3, %v1190_v49  ;;  %v1989_v12 = vpop.eup %1988 }
 0x32b   :  { %v1228_v1 = vmul.f32 %v1989_v12, %v1195_v30 }
 0x32d   :  { %1990 = vtanh.f32 %v1228_v1 }
 0x333   :  { %v1991_v8 = vpop.eup %1990 }
 0x337   :  { %v1282_v61 = vpop.permute.xlu2 %1281  ;;  %v1353_v35 = vpop.permute.xlu1 %1352 }
 0x338   :  { %v1319_v53 = vmul.f32 %v1282_v61, %v2676_v11  ;;  %1692 = vmatmul.msk.f32.gmra.mxu0 %vm730_vm15, %v1353_v35 }
 0x33a   :  { %1370 = vrot.lane.b32.xlu1 %v1319_v53, %s2020_s30 }
 0x33f   :  { %v1278_v39 = vpop.permute.xlu1 %1277  ;;  %v1355_v46 = vpop.permute.xlu0 %1354 }
 0x340   :  { %v1317_v4 = vmul.f32 %v1278_v39, %v2638_v25  ;;  %1693 = vmatmul.msk.f32.gmra.mxu0 %vm730_vm15, %v1355_v46  ;;  %v2021_v46 = vmov 32  }
 0x341   :  { %1734 = vset.pattern.permute.xlu1 %v2021_v46  ;;  %1735 = vset.pattern.permute.xlu0 %v2021_v46 }
 0x342   :  { %1366 = vrot.lane.b32.xlu0 %v1317_v4, %s2020_s30 }
 0x347   :  { %v1363_v11 = vpop.permute.xlu2 %1362  ;;  %v1280_v5 = vpop.permute.xlu0 %1279 }
 0x348   :  { %v1318_v7 = vmul.f32 %v1280_v5, %v2652_v58  ;;  %1694 = vmatmul.msk.f32.gmra.mxu0 %vm730_vm15, %v1357_v57 }
 0x34a   :  { %1291 = vrot.lane.b32.xlu0 %v1991_v8, %s2020_s30  ;;  %1368 = vrot.lane.b32.xlu2 %v1318_v7, %s2020_s30 }
 0x34f   :  { %v1288_v10 = vpop.permute.xlu2 %1287  ;;  %v1359_v9 = vpop.permute.xlu1 %1358 }
 0x350   :  { %v1322_v25 = vmul.f32 %v1288_v10, %v2717_v45  ;;  %1695 = vmatmul.msk.f32.gmra.mxu0 %vm730_vm15, %v1359_v9 }
 0x352   :  { %1376 = vrot.lane.b32.xlu1 %v1322_v25, %s2020_s30 }
 0x357   :  { %v1361_v15 = vpop.permute.xlu0 %1360  ;;  %v1284_v14 = vpop.permute.xlu1 %1283 }
 0x358   :  { %v1320_v19 = vmul.f32 %v1284_v14, %v2698_v50  ;;  %1696 = vmatmul.msk.f32.gmra.mxu0 %vm730_vm15, %v1361_v15 }
 0x35a   :  { %1372 = vrot.lane.b32.xlu2 %v1320_v19, %s2020_s30 }
 0x35f   :  { %v1286_v58 = vpop.permute.xlu0 %1285 }
 0x360   :  { %v1321_v20 = vmul.f32 %v1286_v58, %v2711_v56  ;;  %1697 = vmatmul.msk.f32.gmra.mxu0 %vm730_vm15, %v1363_v11 }
 0x362   :  { %1374 = vrot.lane.b32.xlu0 %v1321_v20, %s2020_s30 }
 0x37c   :  { %v1365_v45 = vpop.permute.xlu1 %1364 }
 0x37d   :  { %1698 = vmatmul.msk.f32.gmra.mxu0 %vm730_vm15, %v1365_v45  ;;  %v2761_v31 = vpop.f32.mrf.mxu0 }
 0x39c   :  { %v1290_v21 = vpop.permute.xlu1 %1289 }
 0x39d   :  { %v1323_v13 = vmul.f32 %v1290_v21, %v1180_v59  ;;  %v1993_v59 = vld [vmem:[%s2795_s4] sm:$0xff]  ;;  %v2022_v21 = vmov 839922192   ;;  %s2023_s4 = smov [#allocation2]  }
 0x39e   :  { %v1333_v52 = vperm.slane %v1993_v59, 2  ;;  %1496 = vperm.xlu1 %1734, %v1993_v59   ;;  %v1503_v45 = vperm.slane %v1993_v59, 3  ;;  %s1584_s7 = sshll.u32 %s2023_s4, 4  ;;  %s1585_s7 = int_to_ptr.vmem [resolvable:$true] %s1584_s7 }
 0x39f   :  { %1378 = vrot.lane.b32.xlu2 %v1323_v13, %s2020_s30  ;;  %v1500_v13 = vunpack.c.l.s4 %v2022_v21 }
 0x3a0   :  { %v1432_v19 = vadd.f32 %v2761_v31, %v1333_v52 }
 0x3a2   :  { %v1479_v20 = vmax.f32 %v1432_v19, 0.0 }
 0x3a4   :  { %v1369_v50 = vpop.permute.xlu2 %1368 }
 0x3ac   :  { %v1371_v56 = vpop.permute.xlu1 %1370 }
 0x3b4   :  { %v1367_v22 = vpop.permute.xlu0 %1366  ;;  %v1373_v24 = vpop.permute.xlu2 %1372 }
 0x3b5   :  { %1699 = vmatmul.msk.f32.gmra.mxu0 %vm730_vm15, %v1367_v22  ;;  %v2763_v33 = vpop.f32.mrf.mxu0  ;;  %v1501_v22 = vunpack.c.0.s8 %v1500_v13 }
 0x3b6   :  { %v1435_v15 = vadd.f32 %v2763_v33, %v1333_v52 }
 0x3b8   :  { %v1480_v58 = vmax.f32 %v1435_v15, 0.0 }
 0x3bc   :  { %v1292_v18 = vpop.permute.xlu0 %1291 }
 0x3bd   :  { %v1324_v23 = vmul.f32 %v1292_v18, %v1195_v30  ;;  %1700 = vmatmul.msk.f32.gmra.mxu0 %vm730_vm15, %v1369_v50  ;;  %v1437_v43 = vpop.f32.mrf.mxu0 }
 0x3be   :  { %v1438_v9 = vadd.f32 %v1437_v43, %v1333_v52 }
 0x3bf   :  { %1380 = vrot.lane.b32.xlu0 %v1324_v23, %s2020_s30 }
 0x3c0   :  { %v1481_v14 = vmax.f32 %v1438_v9, 0.0 }
 0x3c4   :  { %v1377_v37 = vpop.permute.xlu1 %1376 }
 0x3c5   :  { %1701 = vmatmul.msk.f32.gmra.mxu0 %vm730_vm15, %v1371_v56  ;;  %v1440_v38 = vpop.f32.mrf.mxu0 }
 0x3c6   :  { %v1441_v8 = vadd.f32 %v1440_v38, %v1333_v52 }
 0x3c8   :  { %v1482_v25 = vmax.f32 %v1441_v8, 0.0 }
 0x3cd   :  { %1702 = vmatmul.msk.f32.gmra.mxu0 %vm730_vm15, %v1373_v24  ;;  %v1443_v40 = vpop.f32.mrf.mxu0 }
 0x3ce   :  { %v1444_v5 = vadd.f32 %v1443_v40, %v1333_v52 }
 0x3d0   :  { %v1483_v10 = vmax.f32 %v1444_v5, 0.0 }
 0x3d4   :  { %v1375_v28 = vpop.permute.xlu0 %1374 }
 0x3d5   :  { %1703 = vmatmul.msk.f32.gmra.mxu0 %vm730_vm15, %v1375_v28  ;;  %v1446_v6 = vpop.f32.mrf.mxu0 }
 0x3d6   :  { %v1447_v4 = vadd.f32 %v1446_v6, %v1333_v52 }
 0x3d8   :  { %v1484_v7 = vmax.f32 %v1447_v4, 0.0 }
 0x3dd   :  { %1704 = vmatmul.msk.f32.gmra.mxu0 %vm730_vm15, %v1377_v37  ;;  %v1449_v47 = vpop.f32.mrf.mxu0 }
 0x3de   :  { %v1450_v1 = vadd.f32 %v1449_v47, %v1333_v52 }
 0x3e0   :  { %v1485_v11 = vmax.f32 %v1450_v1, 0.0 }
 0x3f9   :  { %v1379_v32 = vpop.permute.xlu2 %1378 }
 0x3fa   :  { %1705 = vmatmul.msk.f32.gmra.mxu0 %vm730_vm15, %v1379_v32  ;;  %v1452_v41 = vpop.f32.mrf.mxu0 }
 0x3fb   :  { %v1453_v30 = vadd.f32 %v1452_v41, %v1333_v52 }
 0x3fd   :  { %v1486_v39 = vmax.f32 %v1453_v30, 0.0 }
 0x410   :  { %v1497_v50 = vpop.permute.xlu1 %1496 }
 0x411   :  { %v1502_v18 = vperm.slane %v1497_v50, %v1501_v22 }
 0x413   :  { %v1505_v23 = vperm.slane %v1502_v18, 3 }
 0x431   :  { %v1381_v34 = vpop.permute.xlu0 %1380 }
 0x432   :  { %1706 = vmatmul.msk.f32.gmra.mxu0 %vm730_vm15, %v1381_v34  ;;  %v1455_v62 = vpop.f32.mrf.mxu0  ;;  %vm1507_vm15 = vcmask 261120  }
 0x433   :  { %v1456_v49 = vadd.f32 %v1455_v62, %v1333_v52 }
 0x435   :  { %v1487_v12 = vmax.f32 %v1456_v49, 0.0 }
 0x43a   :  { %v1458_v27 = vpop.f32.mrf.mxu0 }
 0x43b   :  { %v1459_v53 = vadd.f32 %v1458_v27, %v1333_v52 }
 0x43d   :  { %v1488_v3 = vmax.f32 %v1459_v53, 0.0 }
 0x442   :  { %v1461_v42 = vpop.f32.mrf.mxu0 }
 0x443   :  { %v1462_v61 = vadd.f32 %v1461_v42, %v1333_v52 }
 0x445   :  { %v1489_v35 = vmax.f32 %v1462_v61, 0.0 }
 0x44a   :  { %v1464_v0 = vpop.f32.mrf.mxu0 }
 0x44b   :  { %v1465_v17 = vadd.f32 %v1464_v0, %v1333_v52 }
 0x44d   :  { %v1490_v16 = vmax.f32 %v1465_v17, 0.0 }
 0x452   :  { %v1467_v44 = vpop.f32.mrf.mxu0 }
 0x453   :  { %v1468_v29 = vadd.f32 %v1467_v44, %v1333_v52 }
 0x455   :  { %v1491_v60 = vmax.f32 %v1468_v29, 0.0 }
 0x45a   :  { %v1470_v48 = vpop.f32.mrf.mxu0 }
 0x45b   :  { %v1471_v57 = vadd.f32 %v1470_v48, %v1333_v52 }
 0x45d   :  { %v1492_v2 = vmax.f32 %v1471_v57, 0.0 }
 0x477   :  { %v1473_v51 = vpop.f32.mrf.mxu0 }
 0x478   :  { %v1474_v26 = vadd.f32 %v1473_v51, %v1333_v52 }
 0x47a   :  { %v1493_v36 = vmax.f32 %v1474_v26, 0.0 }
 0x4af   :  { %v1476_v54 = vpop.f32.mrf.mxu0 }
 0x4b0   :  { %v1477_v63 = vadd.f32 %v1476_v54, %v1333_v52 }
 0x4b2   :  { %v1494_v55 = vmax.f32 %v1477_v63, 0.0 }
 0x4b4   :  { %1707 = vmatpush.xpose.msk.msra.mxu1 %vm1507_vm15, %v1494_v55 }
 0x4b8   :  { %1708 = vmatpush.xpose.msk.msra.mxu1 %vm1507_vm15, %v1493_v36 }
 0x4bc   :  { %1709 = vmatpush.xpose.msk.msra.mxu1 %vm1507_vm15, %v1492_v2 }
 0x4c0   :  { %1710 = vmatpush.xpose.msk.msra.mxu1 %vm1507_vm15, %v1491_v60 }
 0x4c4   :  { %1711 = vmatpush.xpose.msk.msra.mxu1 %vm1507_vm15, %v1490_v16 }
 0x4c8   :  { %1712 = vmatpush.xpose.msk.msra.mxu1 %vm1507_vm15, %v1489_v35 }
 0x4cc   :  { %1713 = vmatpush.xpose.msk.msra.mxu1 %vm1507_vm15, %v1488_v3 }
 0x4d0   :  { %1714 = vmatpush.xpose.msk.msra.mxu1 %vm1507_vm15, %v1487_v12 }
 0x4d4   :  { %1715 = vmatpush.xpose.msk.msra.mxu1 %vm1507_vm15, %v1486_v39 }
 0x4d8   :  { %1716 = vmatpush.xpose.msk.msra.mxu1 %vm1507_vm15, %v1485_v11 }
 0x4dc   :  { %1717 = vmatpush.xpose.msk.msra.mxu1 %vm1507_vm15, %v1484_v7 }
 0x4e0   :  { %1718 = vmatpush.xpose.msk.msra.mxu1 %vm1507_vm15, %v1483_v10 }
 0x4e4   :  { %1719 = vmatpush.xpose.msk.msra.mxu1 %vm1507_vm15, %v1482_v25 }
 0x4e8   :  { %1720 = vmatpush.xpose.msk.msra.mxu1 %vm1507_vm15, %v1481_v14 }
 0x4ec   :  { %1721 = vmatpush.xpose.msk.msra.mxu1 %vm1507_vm15, %v1480_v58 }
 0x4f0   :  { %1722 = vmatpush.xpose.msk.msra.mxu1 %vm1507_vm15, %v1479_v20 }
 0x4f3   :  { %1723 = vmatmul.msk.f32.vlgmr.msra.gmra.mxu1 %vm1507_vm15, %v1503_v45 }
 0x570   :  { %v1575_v56 = vpop.f32.mrf.mxu1 }
 0x571   :  { %v1576_v24 = vadd.f32 %v1575_v56, %v1505_v23 }
 0x573   :  { %1578 = vst [vmem:[#allocation2] sm:$0x1] %v1576_v24 }
 0x574   :  { %1589 = dma.vmem_to_hbm [thread:$0]  %s1585_s7, 16, %s1587_s0, [#allocation3]  }
 0x575   :  { %2018 = dma.done.wait [#allocation3], 16  }
 0x576   :  { %2019 = vsyncadd [#allocation3], 4294967280 }
 0x577   :  { %1594 = vsyncpa [#allocation3], 1 }

</bundles_post_ra>
